<compile_context>
chip_gen: v7x
topology: tpu7x:2x2x1
jax: 0.10.0
libtpu: 0.0.40
codegen_flags: <defaults>
</compile_context>

<pallas_src>
import functools
import math

import numpy as np

import jax
import jax.numpy as jnp
from jax.experimental import pallas as pl
from jax.experimental.pallas import tpu as pltpu


NEG_SLOPE = 0.2             # leaky-relu negative slope used by AliasFreeActivation
ACT_GAIN = math.sqrt(2.0)   # filtered_lrelu activation gain (folded into md_h operator)
UP = 2                      # upsample factor inside filtered_lrelu
DOWN = 2                    # AliasFreeConv hard-codes downsample=2
FIR_PAD = 3                 # spatial padding used by the upsample FIR


def _rnd8(n):
    return int(-(-n // 8) * 8)


# ----------------------------------------------------------------------------
# Fused kernel: modulated conv (+bias) + filtered leaky relu, one sample / step
# ----------------------------------------------------------------------------
def alias_free_kernel(strip_ref, mod_ref, wband_ref, dg_ref, bias_ref,
                      mu_ref, muc_ref, md_ref, mdc_ref, o_ref, *, neg_slope):
    """All-MXU fused AliasFreeConv forward for one batch element.

    strip_ref : (1, h1p, K*Wp*Cin)   H-im2col'd zero-padded input, lane-dense
    mod_ref   : (1, 1, K*Wp*Cin)     per-sample style, tiled per-Cin (modulation)
    wband_ref : (K*Wp*Cin, w1p*Cout) W-banded, batch-invariant conv weight
    dg_ref    : (1, 1, w1p*Cout)     demod * input_gain, tiled per-Cout
    bias_ref  : (1, w1p*Cout)        conv bias, tiled per-Cout
    mu_ref    : (hup, h1p)           zero-stuff up + pad + FIR row operator
    muc_ref   : (wup*C, w1p*C)       column up operator (kron FIR x I_C), trans_b dot
    md_ref    : (hdp, hup)           FIR + stride-2 down row operator (* ACT_GAIN)
    mdc_ref   : (wdp*C, wup*C)       column down operator (kron FIR x I_C)
    o_ref     : (1, hdp, wdp*C)      lane-dense output block
    """
    # modulation hoisted onto the input: per-Cin VPU lane broadcast
    strip = strip_ref[0] * mod_ref[0]                               # (h1p, K*Wp*Cin)
    # one deep MXU matmul -> conv output already lane-dense (rows=H, lanes=W*Cout)
    conv = jnp.dot(strip, wband_ref[...],
                   preferred_element_type=jnp.float32)              # (h1p, w1p*C)
    # demodulation * input_gain hoisted onto the output, then conv bias
    state = conv * dg_ref[0] + bias_ref[...]

    # filtered leaky relu: row up, column up, lrelu, row down (gain folded), column down
    s1 = jnp.dot(mu_ref[...], state,
                 preferred_element_type=jnp.float32)                # (hup, w1p*C)
    s2 = jax.lax.dot_general(s1, muc_ref[...], (((1,), (1,)), ((), ())),
                             preferred_element_type=jnp.float32)    # (hup, wup*C)
    s2 = jnp.where(s2 >= 0.0, s2, s2 * neg_slope)                   # ACT_GAIN is in md_ref
    # clamp is None in this configuration -> skipped
    s3 = jnp.dot(md_ref[...], s2,
                 preferred_element_type=jnp.float32)                # (hdp, wup*C)
    s4 = jax.lax.dot_general(s3, mdc_ref[...], (((1,), (1,)), ((), ())),
                             preferred_element_type=jnp.float32)    # (hdp, wdp*C)
    o_ref[0] = s4.astype(o_ref.dtype)


# ----------------------------------------------------------------------------
# Glue: banded FIR operators (parameter setup, plain numpy)
# ----------------------------------------------------------------------------
def upfir_matrix(f1d, in_len, up, pad):
    """M (out_len, in_len): zero-stuff upsample by `up`, pad by `pad`, FIR `f1d*up`."""
    taps = f1d.shape[0]
    out_len = in_len * up + 2 * pad - taps + 1
    m = np.zeros((out_len, in_len), np.float32)
    for i in range(out_len):
        for t in range(taps):
            pos = i + t - pad
            if 0 <= pos < in_len * up and pos % up == 0:
                m[i, pos // up] += float(f1d[t]) * up
    return m


def downfir_matrix(f1d, in_len, down):
    """M (out_len, in_len): FIR with `f1d`, keep every `down`-th output sample."""
    taps = f1d.shape[0]
    out_len = (in_len - taps) // down + 1
    m = np.zeros((out_len, in_len), np.float32)
    for o in range(out_len):
        for t in range(taps):
            m[o, o * down + t] += float(f1d[t])
    return m


def _pad_mat(m, rows, cols):
    out = np.zeros((rows, cols), np.float32)
    out[:m.shape[0], :m.shape[1]] = m
    return out


# ----------------------------------------------------------------------------
# Forward wrapper
# ----------------------------------------------------------------------------
def alias_free_conv_forward(x, style, params):
    """AliasFreeConv forward (eval mode, to_rgb=False). NCHW in / NCHW out."""
    b, cin, h, w = x.shape
    weight = params["weight"]                     # (1, Cout, Cin, K, K)
    cout = weight.shape[1]
    k = weight.shape[-1]
    sdim = style.shape[1]

    pad = k - 1
    h1, w1 = h + k - 1, w + k - 1                 # true modulated-conv output size
    h1p, w1p = _rnd8(h1), _rnd8(w1)               # 8-aligned (extra rows/cols are dead)
    hp2, wp2 = h1p + k - 1, w1p + k - 1           # padded input size
    kdim = k * wp2 * cin                          # conv contraction depth
    nlan = w1p * cout                             # conv output lane width

    fu = np.asarray(params["up_filter"], np.float32)
    fd = np.asarray(params["down_filter"], np.float32)
    tu, td = fu.shape[0], fd.shape[0]
    hu = h1 * UP + 2 * FIR_PAD - tu + 1           # after FIR upsample (rows)
    wu = w1 * UP + 2 * FIR_PAD - tu + 1
    hd = (hu - td) // DOWN + 1                    # after FIR downsample (rows)
    wd = (wu - td) // DOWN + 1
    hup, wup = _rnd8(hu), _rnd8(wu)
    hdp, wdp = _rnd8(hd), _rnd8(wd)

    # ---- glue: tiny per-sample vectors (EqualLinear style, demod * input_gain) ----
    s = style @ (params["mod_weight"] * (1.0 / math.sqrt(sdim))).T + params["mod_bias"]
    wsq = jnp.sum(weight[0] * weight[0], axis=(2, 3))                   # (Cout, Cin)
    demod = jax.lax.rsqrt(
        jnp.sum((s * s)[:, None, :] * wsq[None, :, :], axis=-1) + 1e-8)  # (B, Cout)
    dgain = demod * (1.0 / math.sqrt(float(params["ema_var"])))
    mod_t = jnp.tile(s, (1, k * wp2))[:, None, :].astype(jnp.float32)    # (B, 1, kdim)
    dg_t = jnp.tile(dgain, (1, w1p))[:, None, :].astype(jnp.float32)     # (B, 1, nlan)
    bias_t = jnp.tile(params["bias"][None, :], (1, w1p)).astype(jnp.float32)  # (1, nlan)

    # ---- glue: padded NHWC input + im2col along H only (K-row strips, lane-dense) ----
    x_nhwc = jnp.transpose(x, (0, 2, 3, 1))
    x_pad = jnp.pad(x_nhwc, ((0, 0), (pad, hp2 - h - pad), (pad, wp2 - w - pad), (0, 0)))
    row_idx = np.arange(h1p)[:, None] + np.arange(k)[None, :]            # (h1p, K)
    strips = x_pad[:, row_idx].reshape(b, h1p, kdim).astype(jnp.float32)  # (B, h1p, kdim)

    # ---- glue: W-banded, batch-invariant conv weight (kdim, w1p*Cout) ----
    wt_t = jnp.transpose(weight[0], (2, 3, 1, 0))                        # (K, K, Cin, Cout)
    band = jnp.zeros((k, wp2, cin, w1p, cout), jnp.float32)
    for wpos in range(w1p):
        band = band.at[:, wpos:wpos + k, :, wpos, :].set(wt_t)
    wband = band.reshape(kdim, nlan)

    # ---- glue: FIR operators.  Zero rows/cols (via _pad_mat) kill the dead alignment
    # region that carries the conv bias; ACT_GAIN is folded into md_h. ----
    mu_h = _pad_mat(upfir_matrix(fu, h1, UP, FIR_PAD), hup, h1p)         # (hup, h1p)
    md_h = _pad_mat(downfir_matrix(fd, hu, DOWN), hdp, hup) * ACT_GAIN   # (hdp, hup)
    mu_w = _pad_mat(upfir_matrix(fu, w1, UP, FIR_PAD), wup, w1p)         # (wup, w1p)
    md_w = _pad_mat(downfir_matrix(fd, wu, DOWN), wdp, wup)              # (wdp, wup)
    eye_c = np.eye(cout, dtype=np.float32)
    muc = np.kron(mu_w, eye_c)                                           # (wup*C, w1p*C)
    mdc = np.kron(md_w, eye_c)                                           # (wdp*C, wup*C)

    # scheduler hints: flops / bytes + explicit VMEM budget with headroom
    flops = 2 * b * (h1p * kdim * nlan + hup * h1p * nlan + hup * nlan * wup * cout
                     + hdp * hup * wup * cout + hdp * wup * cout * wdp * cout)
    bytes_accessed = 4 * (b * (h1p * kdim + kdim + 2 * nlan + hdp * wdp * cout)
                          + kdim * nlan + hup * h1p + wup * cout * nlan
                          + hdp * hup + wdp * cout * wup * cout)
    blk_bytes = 4 * (h1p * kdim + kdim * nlan + hup * h1p + wup * cout * nlan
                     + hdp * hup + wdp * cout * wup * cout
                     + hup * wup * cout + hdp * wdp * cout)
    vmem_limit = int(min(100 * 1024 * 1024, max(16 * 1024 * 1024, 6 * blk_bytes)))

    fir_out = pl.pallas_call(
        functools.partial(alias_free_kernel, neg_slope=NEG_SLOPE),
        out_shape=jax.ShapeDtypeStruct((b, hdp, wdp * cout), jnp.float32),
        grid=(b,),
        in_specs=[
            pl.BlockSpec((1, h1p, kdim), lambda i: (i, 0, 0)),           # strips
            pl.BlockSpec((1, 1, kdim), lambda i: (i, 0, 0)),             # modulation
            pl.BlockSpec((kdim, nlan), lambda i: (0, 0)),                # banded weight
            pl.BlockSpec((1, 1, nlan), lambda i: (i, 0, 0)),             # demod * gain
            pl.BlockSpec((1, nlan), lambda i: (0, 0)),                   # bias
            pl.BlockSpec((hup, h1p), lambda i: (0, 0)),                  # mu_h
            pl.BlockSpec((wup * cout, nlan), lambda i: (0, 0)),          # muc
            pl.BlockSpec((hdp, hup), lambda i: (0, 0)),                  # md_h (* gain)
            pl.BlockSpec((wdp * cout, wup * cout), lambda i: (0, 0)),    # mdc
        ],
        out_specs=pl.BlockSpec((1, hdp, wdp * cout), lambda i: (i, 0, 0)),
        compiler_params=pltpu.CompilerParams(
            dimension_semantics=("parallel",), vmem_limit_bytes=vmem_limit),
        cost_estimate=pl.CostEstimate(flops=flops, transcendentals=0,
                                      bytes_accessed=bytes_accessed),
    )(strips, mod_t, wband, dg_t, bias_t,
      jnp.asarray(mu_h), jnp.asarray(muc), jnp.asarray(md_h), jnp.asarray(mdc))

    # free reshape + slice off the alignment padding, then NCHW for the module contract
    out = fir_out.reshape(b, hdp, wdp, cout)[:, :hd, :wd, :]
    return jnp.transpose(out, (0, 3, 1, 2))


# ----------------------------------------------------------------------------
# Pure-JAX reference (same semantics) for validation
# ----------------------------------------------------------------------------
def reference_forward(x, style, params):
    b, cin, h, w = x.shape
    weight = params["weight"]
    cout, k = weight.shape[1], weight.shape[-1]
    sdim = style.shape[1]

    # EqualLinear (lr_mul=1, bias_init=1)
    s = style @ (params["mod_weight"] * (1.0 / math.sqrt(sdim))).T + params["mod_bias"]
    wmod = weight * s[:, None, :, None, None]                           # (B, Cout, Cin, K, K)
    demod = jax.lax.rsqrt(jnp.sum(wmod * wmod, axis=(2, 3, 4)) + 1e-8)  # (B, Cout)
    wmod = wmod * demod[:, :, None, None, None]
    wmod = wmod * (1.0 / math.sqrt(float(params["ema_var"])))

    outs = []
    for i in range(b):
        outs.append(jax.lax.conv_general_dilated(
            x[i:i + 1], wmod[i], window_strides=(1, 1),
            padding=[(k - 1, k - 1), (k - 1, k - 1)],
            dimension_numbers=("NCHW", "OIHW", "NCHW"),
            precision=jax.lax.Precision.HIGHEST))
    out = jnp.concatenate(outs, axis=0)                                 # (B, Cout, H1, W1)

    # filtered_lrelu
    out = out + params["bias"][None, :, None, None]
    fu = np.asarray(params["up_filter"], np.float32)
    fd = np.asarray(params["down_filter"], np.float32)
    h1, w1 = out.shape[2], out.shape[3]

    xu = jnp.zeros((b, cout, h1 * UP, w1 * UP), out.dtype).at[:, :, ::UP, ::UP].set(out)
    xu = jnp.pad(xu, ((0, 0), (0, 0), (FIR_PAD, FIR_PAD), (FIR_PAD, FIR_PAD)))
    tu = fu.shape[0]
    hu = h1 * UP + 2 * FIR_PAD - tu + 1
    wu = w1 * UP + 2 * FIR_PAD - tu + 1
    y = jnp.zeros((b, cout, hu, xu.shape[-1]), jnp.float32)
    for t in range(tu):
        y = y + (float(fu[t]) * UP) * xu[:, :, t:t + hu, :]
    y2 = jnp.zeros((b, cout, hu, wu), jnp.float32)
    for t in range(tu):
        y2 = y2 + (float(fu[t]) * UP) * y[:, :, :, t:t + wu]

    y2 = jnp.where(y2 >= 0.0, y2, y2 * NEG_SLOPE) * ACT_GAIN

    td = fd.shape[0]
    hd = (hu - td) // DOWN + 1
    wd = (wu - td) // DOWN + 1
    z = jnp.zeros((b, cout, hd, wu), jnp.float32)
    for t in range(td):
        z = z + float(fd[t]) * y2[:, :, t:t + (hd - 1) * DOWN + 1:DOWN, :]
    z2 = jnp.zeros((b, cout, hd, wd), jnp.float32)
    for t in range(td):
        z2 = z2 + float(fd[t]) * z[:, :, :, t:t + (wd - 1) * DOWN + 1:DOWN]
    return z2


if __name__ == "__main__":
    B, CIN, COUT, K, SDIM, H, W = 2, 4, 8, 3, 8, 16, 16

    key = jax.random.PRNGKey(0)
    kw, km, kb, kx, ks = jax.random.split(key, 5)

    fir = np.array([1.0, 3.0, 3.0, 1.0], np.float32)
    fir = fir / fir.sum()

    params = {
        # ModulatedConv2d.weight: (1, out_channel, in_channel, k, k)
        "weight": jax.random.normal(kw, (1, COUT, CIN, K, K), jnp.float32),
        # EqualLinear(style_dim -> in_channel), bias_init = 1
        "mod_weight": jax.random.normal(km, (CIN, SDIM), jnp.float32),
        "mod_bias": jnp.ones((CIN,), jnp.float32),
        # module initializes bias to zeros; small deterministic values exercise the path
        "bias": 0.1 * jax.random.normal(kb, (COUT,), jnp.float32),
        "up_filter": jnp.asarray(fir),
        "down_filter": jnp.asarray(fir),
        "ema_var": 1.0,                     # registered buffer (eval mode -> unchanged)
    }

    x = jax.random.normal(kx, (B, CIN, H, W), jnp.float32)
    style = jax.random.normal(ks, (B, SDIM), jnp.float32)

    out = jax.block_until_ready(alias_free_conv_forward(x, style, params))

    ref = jax.block_until_ready(reference_forward(x, style, params))
    # tolerance sized for default (single-pass bf16) MXU rounding across 5 chained matmuls
    np.testing.assert_allclose(np.asarray(out), np.asarray(ref), rtol=2e-2, atol=3e-2)

    print("KERNEL_OK")
</pallas_src>

<mosaic_0001>
module attributes {stable_mosaic.version = 11 : i64} {
  func.func @alias_free_kernel(%arg0: i32, %arg1: memref<1x24x312xf32, #tpu.memory_space<vmem>>, %arg2: memref<1x1x312xf32, #tpu.memory_space<vmem>>, %arg3: memref<312x192xf32, #tpu.memory_space<vmem>>, %arg4: memref<1x1x192xf32, #tpu.memory_space<vmem>>, %arg5: memref<1x192xf32, #tpu.memory_space<vmem>>, %arg6: memref<40x24xf32, #tpu.memory_space<vmem>>, %arg7: memref<320x192xf32, #tpu.memory_space<vmem>>, %arg8: memref<24x40xf32, #tpu.memory_space<vmem>>, %arg9: memref<192x320xf32, #tpu.memory_space<vmem>>, %arg10: memref<1x24x192xf32, #tpu.memory_space<vmem>>) attributes {dimension_semantics = [#tpu.dimension_semantics<parallel>], iteration_bounds = array<i64: 2>, scalar_prefetch = 0 : i64, scratch_operands = 0 : i64, tpu.core_type = #tpu.core_type<tc>, window_params = [{transform_indices = @transform_0, window_bounds = array<i64: 1, 24, 312>}, {transform_indices = @transform_1, window_bounds = array<i64: 1, 1, 312>}, {pipeline_mode = #tpu.pipeline_mode<synchronous>, transform_indices = @transform_2, window_bounds = array<i64: 312, 192>}, {transform_indices = @transform_3, window_bounds = array<i64: 1, 1, 192>}, {pipeline_mode = #tpu.pipeline_mode<synchronous>, transform_indices = @transform_4, window_bounds = array<i64: 1, 192>}, {pipeline_mode = #tpu.pipeline_mode<synchronous>, transform_indices = @transform_5, window_bounds = array<i64: 40, 24>}, {pipeline_mode = #tpu.pipeline_mode<synchronous>, transform_indices = @transform_6, window_bounds = array<i64: 320, 192>}, {pipeline_mode = #tpu.pipeline_mode<synchronous>, transform_indices = @transform_7, window_bounds = array<i64: 24, 40>}, {pipeline_mode = #tpu.pipeline_mode<synchronous>, transform_indices = @transform_8, window_bounds = array<i64: 192, 320>}, {transform_indices = @transform_9, window_bounds = array<i64: 1, 24, 192>}]} {
    %c0 = arith.constant 0 : index
    %c0_0 = arith.constant 0 : index
    %c0_1 = arith.constant 0 : index
    %0 = vector.load %arg1[%c0, %c0_0, %c0_1] : memref<1x24x312xf32, #tpu.memory_space<vmem>>, vector<1x24x312xf32>
    %1 = vector.shape_cast %0 : vector<1x24x312xf32> to vector<24x312xf32>
    %c0_2 = arith.constant 0 : index
    %c0_3 = arith.constant 0 : index
    %c0_4 = arith.constant 0 : index
    %2 = vector.load %arg2[%c0_2, %c0_3, %c0_4] : memref<1x1x312xf32, #tpu.memory_space<vmem>>, vector<1x1x312xf32>
    %3 = vector.shape_cast %2 : vector<1x1x312xf32> to vector<1x312xf32>
    %4 = vector.broadcast %3 : vector<1x312xf32> to vector<24x312xf32>
    %5 = arith.mulf %1, %4 : vector<24x312xf32>
    %c0_5 = arith.constant 0 : index
    %c0_6 = arith.constant 0 : index
    %6 = vector.load %arg3[%c0_5, %c0_6] : memref<312x192xf32, #tpu.memory_space<vmem>>, vector<312x192xf32>
    %cst = arith.constant dense<0.000000e+00> : vector<24x192xf32>
    %7 = tpu.matmul %5, %6, %cst {dimension_numbers = #tpu.dot_dimension_numbers<[1], [0], [0], [1], [0, 0, 1, 1], [], []>} : vector<24x312xf32>, vector<312x192xf32>, vector<24x192xf32> -> vector<24x192xf32>
    %c0_7 = arith.constant 0 : index
    %c0_8 = arith.constant 0 : index
    %c0_9 = arith.constant 0 : index
    %8 = vector.load %arg4[%c0_7, %c0_8, %c0_9] : memref<1x1x192xf32, #tpu.memory_space<vmem>>, vector<1x1x192xf32>
    %9 = vector.shape_cast %8 : vector<1x1x192xf32> to vector<1x192xf32>
    %10 = vector.broadcast %9 : vector<1x192xf32> to vector<24x192xf32>
    %11 = arith.mulf %7, %10 : vector<24x192xf32>
    %c0_10 = arith.constant 0 : index
    %c0_11 = arith.constant 0 : index
    %12 = vector.load %arg5[%c0_10, %c0_11] : memref<1x192xf32, #tpu.memory_space<vmem>>, vector<1x192xf32>
    %13 = vector.broadcast %12 : vector<1x192xf32> to vector<24x192xf32>
    %14 = arith.addf %11, %13 : vector<24x192xf32>
    %c0_12 = arith.constant 0 : index
    %c0_13 = arith.constant 0 : index
    %15 = vector.load %arg6[%c0_12, %c0_13] : memref<40x24xf32, #tpu.memory_space<vmem>>, vector<40x24xf32>
    %cst_14 = arith.constant dense<0.000000e+00> : vector<40x192xf32>
    %16 = tpu.matmul %15, %14, %cst_14 {dimension_numbers = #tpu.dot_dimension_numbers<[1], [0], [0], [1], [0, 0, 1, 1], [], []>} : vector<40x24xf32>, vector<24x192xf32>, vector<40x192xf32> -> vector<40x192xf32>
    %c0_15 = arith.constant 0 : index
    %c0_16 = arith.constant 0 : index
    %17 = vector.load %arg7[%c0_15, %c0_16] : memref<320x192xf32, #tpu.memory_space<vmem>>, vector<320x192xf32>
    %cst_17 = arith.constant dense<0.000000e+00> : vector<40x320xf32>
    %18 = tpu.matmul %16, %17, %cst_17 {dimension_numbers = #tpu.dot_dimension_numbers<[1], [1], [0], [0], [0, 0, 1, 0], [], []>} : vector<40x192xf32>, vector<320x192xf32>, vector<40x320xf32> -> vector<40x320xf32>
    %cst_18 = arith.constant 0.000000e+00 : f32
    %19 = vector.broadcast %cst_18 : f32 to vector<40x320xf32>
    %20 = arith.cmpf oge, %18, %19 : vector<40x320xf32>
    %cst_19 = arith.constant 2.000000e-01 : f32
    %21 = vector.broadcast %cst_19 : f32 to vector<40x320xf32>
    %22 = arith.mulf %18, %21 : vector<40x320xf32>
    %23 = arith.select %20, %18, %22 : vector<40x320xi1>, vector<40x320xf32>
    %c0_20 = arith.constant 0 : index
    %c0_21 = arith.constant 0 : index
    %24 = vector.load %arg8[%c0_20, %c0_21] : memref<24x40xf32, #tpu.memory_space<vmem>>, vector<24x40xf32>
    %cst_22 = arith.constant dense<0.000000e+00> : vector<24x320xf32>
    %25 = tpu.matmul %24, %23, %cst_22 {dimension_numbers = #tpu.dot_dimension_numbers<[1], [0], [0], [1], [0, 0, 1, 1], [], []>} : vector<24x40xf32>, vector<40x320xf32>, vector<24x320xf32> -> vector<24x320xf32>
    %c0_23 = arith.constant 0 : index
    %c0_24 = arith.constant 0 : index
    %26 = vector.load %arg9[%c0_23, %c0_24] : memref<192x320xf32, #tpu.memory_space<vmem>>, vector<192x320xf32>
    %cst_25 = arith.constant dense<0.000000e+00> : vector<24x192xf32>
    %27 = tpu.matmul %25, %26, %cst_25 {dimension_numbers = #tpu.dot_dimension_numbers<[1], [1], [0], [0], [0, 0, 1, 0], [], []>} : vector<24x320xf32>, vector<192x320xf32>, vector<24x192xf32> -> vector<24x192xf32>
    %c0_26 = arith.constant 0 : index
    %c0_27 = arith.constant 0 : index
    %c0_28 = arith.constant 0 : index
    %28 = vector.load %arg10[%c0_26, %c0_27, %c0_28] : memref<1x24x192xf32, #tpu.memory_space<vmem>>, vector<1x24x192xf32>
    %29 = vector.shape_cast %28 : vector<1x24x192xf32> to vector<24x192xf32>
    %30 = vector.shape_cast %27 : vector<24x192xf32> to vector<1x24x192xf32>
    tpu.vector_store %arg10[%c0_26, %c0_27, %c0_28], %30 {strides = array<i32>} : memref<1x24x192xf32, #tpu.memory_space<vmem>>, vector<1x24x192xf32>,
    return
  }
  func.func @transform_0(%arg0: i32) -> (i32, i32, i32) {
    %c0_i32 = arith.constant 0 : i32
    %c0_i32_0 = arith.constant 0 : i32
    %c0_i32_1 = arith.constant 0 : i32
    return %arg0, %c0_i32, %c0_i32_0 : i32, i32, i32
  }
  func.func @transform_1(%arg0: i32) -> (i32, i32, i32) {
    %c0_i32 = arith.constant 0 : i32
    %c0_i32_0 = arith.constant 0 : i32
    %c0_i32_1 = arith.constant 0 : i32
    return %arg0, %c0_i32, %c0_i32_0 : i32, i32, i32
  }
  func.func @transform_2(%arg0: i32) -> (i32, i32) {
    %c0_i32 = arith.constant 0 : i32
    %c0_i32_0 = arith.constant 0 : i32
    %c0_i32_1 = arith.constant 0 : i32
    return %c0_i32, %c0_i32_0 : i32, i32
  }
  func.func @transform_3(%arg0: i32) -> (i32, i32, i32) {
    %c0_i32 = arith.constant 0 : i32
    %c0_i32_0 = arith.constant 0 : i32
    %c0_i32_1 = arith.constant 0 : i32
    return %arg0, %c0_i32, %c0_i32_0 : i32, i32, i32
  }
  func.func @transform_4(%arg0: i32) -> (i32, i32) {
    %c0_i32 = arith.constant 0 : i32
    %c0_i32_0 = arith.constant 0 : i32
    %c0_i32_1 = arith.constant 0 : i32
    return %c0_i32, %c0_i32_0 : i32, i32
  }
  func.func @transform_5(%arg0: i32) -> (i32, i32) {
    %c0_i32 = arith.constant 0 : i32
    %c0_i32_0 = arith.constant 0 : i32
    %c0_i32_1 = arith.constant 0 : i32
    return %c0_i32, %c0_i32_0 : i32, i32
  }
  func.func @transform_6(%arg0: i32) -> (i32, i32) {
    %c0_i32 = arith.constant 0 : i32
    %c0_i32_0 = arith.constant 0 : i32
    %c0_i32_1 = arith.constant 0 : i32
    return %c0_i32, %c0_i32_0 : i32, i32
  }
  func.func @transform_7(%arg0: i32) -> (i32, i32) {
    %c0_i32 = arith.constant 0 : i32
    %c0_i32_0 = arith.constant 0 : i32
    %c0_i32_1 = arith.constant 0 : i32
    return %c0_i32, %c0_i32_0 : i32, i32
  }
  func.func @transform_8(%arg0: i32) -> (i32, i32) {
    %c0_i32 = arith.constant 0 : i32
    %c0_i32_0 = arith.constant 0 : i32
    %c0_i32_1 = arith.constant 0 : i32
    return %c0_i32, %c0_i32_0 : i32, i32
  }
  func.func @transform_9(%arg0: i32) -> (i32, i32, i32) {
    %c0_i32 = arith.constant 0 : i32
    %c0_i32_0 = arith.constant 0 : i32
    %c0_i32_1 = arith.constant 0 : i32
    return %arg0, %c0_i32, %c0_i32_0 : i32, i32, i32
  }
}

</mosaic_0001>

<bundles_post_ra>
// kernel: tpu_custom_call.1
= control target key start
LH: loop header
LB: loop body
LE: loop exit
PB: predicated region body
PF: predicated region fallthrough
CT: control target
= control target key end

     0   :  { %14 = vsyncpa [#allocation3], 0  ;;  %s3448_s0 = inlined_call_operand.vmem [shape: f32[2,24,312], index: 0, kind: input, shape index: {}]   ;;  %s3449_s1 = inlined_call_operand.vmem [shape: f32[2,1,312], index: 1, kind: input, shape index: {}]   ;;  %s3450_s2 = inlined_call_operand.vmem [shape: f32[312,192], index: 2, kind: input, shape index: {}]   ;;  %s3451_s3 = inlined_call_operand.vmem [shape: f32[2,1,192], index: 3, kind: input, shape index: {}]   ;;  %s3452_s4 = inlined_call_operand.vmem [shape: f32[1,192], index: 4, kind: input, shape index: {}]   ;;  %s3453_s5 = inlined_call_operand.vmem [shape: f32[40,24], index: 5, kind: input, shape index: {}]   ;;  %s3454_s6 = inlined_call_operand.vmem [shape: f32[320,192], index: 6, kind: input, shape index: {}]   ;;  %s3455_s7 = inlined_call_operand.vmem [shape: f32[24,40], index: 7, kind: input, shape index: {}]   ;;  %s3456_s8 = inlined_call_operand.vmem [shape: f32[192,320], index: 8, kind: input, shape index: {}]   ;;  %s3457_s9 = inlined_call_operand.hbm [shape: f32[2,24,192], index: 9, kind: output, shape index: {}]  }
   0x1   :  { %16 = vsyncpa [#allocation3 + $0x1], 0  ;;  %s2450_s30 = smov 0   ;;  %s2452_s10 = smov 0  }
   0x2   :  { %s2454_s11 = smov 0   ;;  %s2456_s12 = smov 0  }
   0x3 LB: > { %3461 = sst [smem:[#allocation5_spill]] %s2388_s11  ;;  %s2471_s13 = sadd.s32 4294967295, %s2392_s12   ;;  %s2392_s12 = sphi %s2456_s12, %s3468_s12   ;;  %s2388_s11 = sphi %s2454_s11, %s3470_s11   ;;  %s2384_s10 = sphi %s2452_s10, %s3472_s10   ;;  %s2380_s30 = sphi %s2450_s30, %s3471_s30  }
   0x4   : > { %s1853_s14 = sadd.s32 4294967294, %s2392_s12   ;;  %s2475_s15 = sadd.s32 1, %s2392_s12  }
   0x5   : > { %3462 = sst [smem:[#allocation6_spill]] %s2475_s15  ;;  %s233_s16 = sadd.s32 1, %s2388_s11 }
   0x6   : > { %s230_s17 = ssub.s32 %s2392_s12, %s2475_s15  ;;  %p243_p0 = scmp.ne.s32.totalorder %s2388_s11, %s2384_s10 }
   0x7   : > { %p231_p1 = scmp.eq.s32.totalorder %s230_s17, 0  ;;  %p244_p2 = scmp.eq.s32.totalorder %s2471_s13, 1 }
   0x8   : > { %p249_p3 = scmp.ne.s32.totalorder %s2384_s10, %s2380_s30  ;;  %p250_p4 = scmp.eq.s32.totalorder %s1853_s14, 1 }
   0x9   : > { %s2486_s18 = scalar_select %p231_p1, %s2388_s11, %s233_s16  }
   0xa   : > { %p2488_p5 = por %p244_p2, %p243_p0  ;;  %p2492_p6 = por %p250_p4, %p249_p3 }
   0xb   : > { %3463 = sst [smem:[#allocation7_spill]] %s2486_s18  ;;  %p1856_p7 = scmp.ge.s32.totalorder %s2392_s12, 1 }
   0xc   : > { %p308_p8 = scmp.lt.s32.totalorder %s2392_s12, 3 }
   0xe   : > { %p309_p9 = pnand %p1856_p7, %p308_p8 }
   0xf   : > { %v401_v0 = vld [vmem:[%s3450_s2 + $0x8] sm:$0xff] (!%p309_p9)  ;;  %v403_v1 = vld [vmem:[%s3450_s2 + $0x18] sm:$0xff] (!%p309_p9)  ;;  %v400_v2 = vld [vmem:[%s3450_s2] sm:$0xff] (!%p309_p9)  ;;  %v2394_v7 = vmov (!%p309_p9), 0.0   ;;  %p352_p10 = scmp.lt.s32.totalorder (!%p309_p9), %s2471_s13, 1  ;;  %v376_v26 = vlaneseq (!%p309_p9)  ;;  %vm478_vm0 = vcmask (!%p309_p9), 457728  }
  0x10   : > { %312 = sbr.rel (%p309_p9) target bundleno = 1238 (0x4d6), region = 56  ;;  %v1980_v3 = vpack.c.bf16 (!%p309_p9), %v403_v1, %v401_v0  ;;  %v402_v4 = vld [vmem:[%s3450_s2 + $0x10] sm:$0xff] (!%p309_p9)  ;;  %v405_v5 = vld [vmem:[%s3450_s2 + $0x28] sm:$0xff] (!%p309_p9)  ;;  %v407_v6 = vld [vmem:[%s3450_s2 + $0x38] sm:$0xff] (!%p309_p9)  ;;  %775 = vmatprep.mubr.f32.mxu1 (!%p309_p9), %v2394_v7  ;;  %vm886_vm1 = vcmask (!%p309_p9), 523264   ;;  %vm695_vm3 = vcmask (!%p309_p9), 195584  }
  0x11   : > { %v1982_v8 = vpack.c.bf16 (!%p309_p9), %v402_v4, %v400_v2  ;;  %v1984_v9 = vpack.c.bf16 (!%p309_p9), %v407_v6, %v405_v5  ;;  %v404_v10 = vld [vmem:[%s3450_s2 + $0x20] sm:$0xff] (!%p309_p9)  ;;  %v406_v11 = vld [vmem:[%s3450_s2 + $0x30] sm:$0xff] (!%p309_p9)  ;;  %v409_v12 = vld [vmem:[%s3450_s2 + $0x48] sm:$0xff] (!%p309_p9)  ;;  %v2571_v33 = vshrl.u32 (!%p309_p9), %v376_v26, 7  ;;  %s349_s29 = sand.u32 (!%p309_p9), 1, %s2384_s10  }
  0x12   : > { %1981 = vmatprep.subr.bf16.mxu0 (!%p309_p9), %v1980_v3  ;;  %v411_v13 = vld [vmem:[%s3450_s2 + $0x58] sm:$0xff] (!%p309_p9)  ;;  %v1986_v14 = vpack.c.bf16 (!%p309_p9), %v406_v11, %v404_v10  ;;  %v408_v16 = vld [vmem:[%s3450_s2 + $0x40] sm:$0xff] (!%p309_p9)  ;;  %v410_v17 = vld [vmem:[%s3450_s2 + $0x50] sm:$0xff] (!%p309_p9)  ;;  %s2282_s17 = smul.u32 (!%p309_p9), 48, %s349_s29 }
  0x13   : > { %1983 = vmatpush1.bf16.msra.mxu0 (!%p309_p9), %v1982_v8  ;;  %v1988_v15 = vpack.c.bf16 (!%p309_p9), %v411_v13, %v409_v12  ;;  %v413_v18 = vld [vmem:[%s3450_s2 + $0x68] sm:$0xff] (!%p309_p9)  ;;  %v415_v19 = vld [vmem:[%s3450_s2 + $0x78] sm:$0xff] (!%p309_p9)  ;;  %v1990_v20 = vpack.c.bf16 (!%p309_p9), %v410_v17, %v408_v16  ;;  %v412_v22 = vld [vmem:[%s3450_s2 + $0x60] sm:$0xff] (!%p309_p9)  ;;  %v2594_v40 = vsub.s32 (!%p309_p9), 1, %v2571_v33 }
  0x14   : > { %1985 = vmatprep.subr.bf16.mxu0 (!%p309_p9), %v1984_v9  ;;  %v1992_v21 = vpack.c.bf16 (!%p309_p9), %v415_v19, %v413_v18  ;;  %v414_v23 = vld [vmem:[%s3450_s2 + $0x70] sm:$0xff] (!%p309_p9)  ;;  %v417_v24 = vld [vmem:[%s3450_s2 + $0x88] sm:$0xff] (!%p309_p9)  ;;  %v419_v25 = vld [vmem:[%s3450_s2 + $0x98] sm:$0xff] (!%p309_p9) }
  0x15   : > { %v1994_v27 = vpack.c.bf16 (!%p309_p9), %v414_v23, %v412_v22  ;;  %v1996_v28 = vpack.c.bf16 (!%p309_p9), %v419_v25, %v417_v24  ;;  %v416_v29 = vld [vmem:[%s3450_s2 + $0x80] sm:$0xff] (!%p309_p9)  ;;  %v418_v30 = vld [vmem:[%s3450_s2 + $0x90] sm:$0xff] (!%p309_p9)  ;;  %v421_v31 = vld [vmem:[%s3450_s2 + $0xa8] sm:$0xff] (!%p309_p9) }
  0x16   : > { %v423_v32 = vld [vmem:[%s3450_s2 + $0xb8] sm:$0xff] (!%p309_p9)  ;;  %v1998_v34 = vpack.c.bf16 (!%p309_p9), %v418_v30, %v416_v29  ;;  %v420_v36 = vld [vmem:[%s3450_s2 + $0xa0] sm:$0xff] (!%p309_p9)  ;;  %v422_v37 = vld [vmem:[%s3450_s2 + $0xb0] sm:$0xff] (!%p309_p9) }
  0x17   : > { %1987 = vmatpush1.bf16.msra.mxu0 %v1986_v14  ;;  %s2555_s21 = scalar_select %p352_p10, %s2471_s13, 1  ;;  %v2000_v35 = vpack.c.bf16 %v423_v32, %v421_v31  ;;  %v425_v38 = vld [vmem:[%s3450_s2 + $0xc8] sm:$0xff]  ;;  %v427_v39 = vld [vmem:[%s3450_s2 + $0xd8] sm:$0xff]  ;;  %v2002_v41 = vpack.c.bf16 %v422_v37, %v420_v36  ;;  %v424_v43 = vld [vmem:[%s3450_s2 + $0xc0] sm:$0xff]  ;;  %v2713_v37 = vsub.s32 0, %v2571_v33 }
  0x18   : > { %1989 = vmatprep.subr.bf16.mxu0 %v1988_v15  ;;  %v2004_v42 = vpack.c.bf16 %v427_v39, %v425_v38  ;;  %v426_v44 = vld [vmem:[%s3450_s2 + $0xd0] sm:$0xff]  ;;  %v429_v45 = vld [vmem:[%s3450_s2 + $0xe8] sm:$0xff]  ;;  %v431_v46 = vld [vmem:[%s3450_s2 + $0xf8] sm:$0xff] }
  0x19   : > { %s2283_s14 = smul.u32 72, %s2555_s21  ;;  %v2006_v50 = vpack.c.bf16 %v426_v44, %v424_v43  ;;  %v2008_v51 = vpack.c.bf16 %v431_v46, %v429_v45  ;;  %v428_v52 = vld [vmem:[%s3450_s2 + $0xe0] sm:$0xff]  ;;  %v430_v53 = vld [vmem:[%s3450_s2 + $0xf0] sm:$0xff]  ;;  %v433_v55 = vld [vmem:[%s3450_s2 + $0x108] sm:$0xff] }
  0x1a   : > { %s2284_s16 = smul.u32 3, %s2555_s21  ;;  %v435_v56 = vld [vmem:[%s3450_s2 + $0x118] sm:$0xff]  ;;  %v2010_v57 = vpack.c.bf16 %v430_v53, %v428_v52  ;;  %v432_v59 = vld [vmem:[%s3450_s2 + $0x100] sm:$0xff]  ;;  %v434_v60 = vld [vmem:[%s3450_s2 + $0x110] sm:$0xff] }
  0x1b   : > { %1991 = vmatpush1.bf16.msra.mxu0 %v1990_v20  ;;  %s2588_s11 = scalar_lea.vmem %s3448_s0, %s2283_s14  ;;  %v2012_v58 = vpack.c.bf16 %v435_v56, %v433_v55  ;;  %v437_v61 = vld [vmem:[%s3450_s2 + $0x128] sm:$0xff]  ;;  %v439_v62 = vld [vmem:[%s3450_s2 + $0x138] sm:$0xff]  ;;  %v2014_v63 = vpack.c.bf16 %v434_v60, %v432_v59  ;;  %v436_v1 = vld [vmem:[%s3450_s2 + $0x120] sm:$0xff]  ;;  %s2397_s14 = smov [#allocation2]  }
  0x1c   : > { %1993 = vmatprep.subr.bf16.mxu0 %v1992_v21  ;;  %s360_s22 = scalar_lea.vmem %s3449_s1, %s2284_s16  ;;  %v366_v47 = vld [vmem:[%s2588_s11 + $0x8] sm:$0xff]  ;;  %v2016_v0 = vpack.c.bf16 %v439_v62, %v437_v61  ;;  %v438_v2 = vld [vmem:[%s3450_s2 + $0x130] sm:$0xff]  ;;  %v443_v4 = vld [vmem:[%s3450_s2 + $0x158] sm:$0xff]  ;;  %s2334_s26 = sshll.u32 %s2397_s14, 4  ;;  %s2335_s26 = int_to_ptr.vmem [resolvable:$false] %s2334_s26 }
  0x1d   : > { %v2609_v48 = vld [vmem:[%s360_s22] sm:$0x7]  ;;  %v441_v3 = vld [vmem:[%s3450_s2 + $0x148] sm:$0xff]  ;;  %v2018_v5 = vpack.c.bf16 %v438_v2, %v436_v1  ;;  %v442_v9 = vld [vmem:[%s3450_s2 + $0x150] sm:$0xff]  ;;  %s351_s22 = scalar_lea.vmem [#allocation2], %s2282_s17 }
  0x1e   : > { %v2613_v49 = vrot.slane %v2609_v48, %v2594_v40  ;;  %v2020_v6 = vpack.c.bf16 %v443_v4, %v441_v3  ;;  %v440_v8 = vld [vmem:[%s3450_s2 + $0x140] sm:$0xff]  ;;  %v445_v10 = vld [vmem:[%s3450_s2 + $0x168] sm:$0xff]  ;;  %v447_v11 = vld [vmem:[%s3450_s2 + $0x178] sm:$0xff]  ;;  %v379_v45 = vrot.slane %v2609_v48, %v2713_v37  ;;  %s1767_s23 = sshll.u32 %s351_s22, 4  ;;  %s3399_s23 = int_to_ptr.vmem [resolvable:$true] %s1767_s23 }
  0x1f   : > { %1995 = vmatpush1.bf16.msra.mxu0 %v1994_v27  ;;  %v2022_v12 = vpack.c.bf16 %v442_v9, %v440_v8  ;;  %v2024_v13 = vpack.c.bf16 %v447_v11, %v445_v10  ;;  %v444_v14 = vld [vmem:[%s3450_s2 + $0x160] sm:$0xff]  ;;  %v446_v15 = vld [vmem:[%s3450_s2 + $0x170] sm:$0xff]  ;;  %v449_v16 = vld [vmem:[%s3450_s2 + $0x188] sm:$0xff]  ;;  %p2337_p0 = scmp.lt.s32.totalorder %s3399_s23, %s2335_s26 }
  0x20   : > { %1997 = vmatprep.subr.bf16.mxu0 %v1996_v28  ;;  %v392_v54 = vmul.f32 %v2613_v49, %v366_v47  ;;  %v451_v17 = vld [vmem:[%s3450_s2 + $0x198] sm:$0xff]  ;;  %v2026_v18 = vpack.c.bf16 %v446_v15, %v444_v14  ;;  %v448_v20 = vld [vmem:[%s3450_s2 + $0x180] sm:$0xff]  ;;  %v450_v21 = vld [vmem:[%s3450_s2 + $0x190] sm:$0xff] }
  0x21   : > { %v2028_v19 = vpack.c.bf16 %v451_v17, %v449_v16  ;;  %v453_v22 = vld [vmem:[%s3450_s2 + $0x1a8] sm:$0xff]  ;;  %v455_v23 = vld [vmem:[%s3450_s2 + $0x1b8] sm:$0xff]  ;;  %v2030_v24 = vpack.c.bf16 %v450_v21, %v448_v20  ;;  %v452_v26 = vld [vmem:[%s3450_s2 + $0x1a0] sm:$0xff] }
  0x22   : > { %552 = vmatprep.mubr.f32.mxu0 %v392_v54  ;;  %v2032_v25 = vpack.c.bf16 %v455_v23, %v453_v22  ;;  %v454_v27 = vld [vmem:[%s3450_s2 + $0x1b0] sm:$0xff]  ;;  %v457_v28 = vld [vmem:[%s3450_s2 + $0x1c8] sm:$0xff]  ;;  %v459_v29 = vld [vmem:[%s3450_s2 + $0x1d8] sm:$0xff] }
  0x23   : > { %1999 = vmatpush1.bf16.msra.mxu0 %v1998_v34  ;;  %v2034_v30 = vpack.c.bf16 %v454_v27, %v452_v26  ;;  %v2036_v31 = vpack.c.bf16 %v459_v29, %v457_v28  ;;  %v456_v32 = vld [vmem:[%s3450_s2 + $0x1c0] sm:$0xff]  ;;  %v458_v34 = vld [vmem:[%s3450_s2 + $0x1d0] sm:$0xff]  ;;  %v463_v36 = vld [vmem:[%s3450_s2 + $0x1f8] sm:$0xff] }
  0x24   : > { %2001 = vmatprep.subr.bf16.mxu0 %v2000_v35  ;;  %v461_v35 = vld [vmem:[%s3450_s2 + $0x1e8] sm:$0xff]  ;;  %v2038_v38 = vpack.c.bf16 %v458_v34, %v456_v32  ;;  %v467_v44 = vld [vmem:[%s3450_s2 + $0x218] sm:$0xff]  ;;  %v365_v47 = vld [vmem:[%s2588_s11] sm:$0xff] }
  0x25   : > { %v2040_v39 = vpack.c.bf16 %v463_v36, %v461_v35  ;;  %v465_v43 = vld [vmem:[%s3450_s2 + $0x208] sm:$0xff]  ;;  %v466_v52 = vld [vmem:[%s3450_s2 + $0x210] sm:$0xff]  ;;  %v369_v53 = vld [vmem:[%s2588_s11 + $0x20] sm:$0xff]  ;;  %v391_v56 = vmul.f32 %v379_v45, %v365_v47 }
  0x26   : > { %v469_v54 = vld [vmem:[%s3450_s2 + $0x228] sm:$0xff]  ;;  %v471_v55 = vld [vmem:[%s3450_s2 + $0x238] sm:$0xff]  ;;  %v468_v61 = vld [vmem:[%s3450_s2 + $0x220] sm:$0xff] }
  0x27   : > { %2003 = vmatpush1.bf16.msra.mxu0 %v2002_v41  ;;  %v460_v41 = vld [vmem:[%s3450_s2 + $0x1e0] sm:$0xff]  ;;  %v368_v59 = vld [vmem:[%s2588_s11 + $0x18] sm:$0xff]  ;;  %v2048_v60 = vpack.c.bf16 %v471_v55, %v469_v54  ;;  %v470_v62 = vld [vmem:[%s3450_s2 + $0x230] sm:$0xff] }
  0x28   : > { %2005 = vmatprep.subr.bf16.mxu0 %v2004_v42  ;;  %v462_v42 = vld [vmem:[%s3450_s2 + $0x1f0] sm:$0xff]  ;;  %v475_v1 = vld [vmem:[%s3450_s2 + $0x258] sm:$0xff]  ;;  %v394_v2 = vmul.f32 %v379_v45, %v368_v59  ;;  %v2050_v3 = vpack.c.bf16 %v470_v62, %v468_v61  ;;  %v472_v9 = vld [vmem:[%s3450_s2 + $0x240] sm:$0xff] }
  0x29   : > { %v2042_v46 = vpack.c.bf16 %v462_v42, %v460_v41  ;;  %v474_v10 = vld [vmem:[%s3450_s2 + $0x250] sm:$0xff]  ;;  %v476_v15 = vld [vmem:[%s3450_s2 + $0x260] sm:$0xff]  ;;  %v873_v20 = vld [vmem:[%s3454_s6 + $0x218] sm:$0xff] }
  0x2a   : > { %v373_v17 = vld [vmem:[%s2588_s11 + $0x40] sm:$0xff]  ;;  %vm2788_vm2 = vmpackc.low %vm886_vm1, %vm886_vm1  ;;  %v875_v26 = vld [vmem:[%s3454_s6 + $0x228] sm:$0xff] }
  0x2b   : > { %2007 = vmatpush1.bf16.msra.mxu0 %v2006_v50  ;;  %v2044_v50 = vpack.c.bf16 %v467_v44, %v465_v43  ;;  %v870_v23 = vld [vmem:[%s3454_s6 + $0x200] sm:$0xff]  ;;  %v877_v27 = vld [vmem:[%s3454_s6 + $0x238] sm:$0xff]  ;;  %v876_v36 = vld [vmem:[%s3454_s6 + $0x230] sm:$0xff] }
  0x2c   : > { %2009 = vmatprep.subr.bf16.mxu0 %v2008_v51  ;;  %v464_v51 = vld [vmem:[%s3450_s2 + $0x200] sm:$0xff]  ;;  %v2145_v29 = vpack.c.bf16 %v877_v27, %v875_v26  ;;  %v879_v42 = vld [vmem:[%s3454_s6 + $0x248] sm:$0xff]  ;;  %v881_v43 = vld [vmem:[%s3454_s6 + $0x258] sm:$0xff] }
  0x2d   : > { %v672_v34 = vld [vmem:[%s3452_s4] sm:$0x3] }
  0x2e   : > { %v874_v35 = vld [vmem:[%s3454_s6 + $0x220] sm:$0xff] }
  0x2f   : > { %2011 = vmatpush1.bf16.msra.mxu0 %v2010_v57  ;;  %v2046_v57 = vpack.c.bf16 %v466_v52, %v464_v51  ;;  %v2148_v41 = vpack.c.bf16 %v876_v36, %v874_v35  ;;  %v878_v59 = vld [vmem:[%s3454_s6 + $0x240] sm:$0xff]  ;;  %v820_v36 = vld [vmem:[%s3454_s6 + $0x70] sm:$0xff] }
  0x30   : > { %2013 = vmatprep.subr.bf16.mxu0 %v2012_v58  ;;  %v395_v58 = vmul.f32 %v2613_v49, %v369_v53  ;;  %v694_v27 = vld [vmem:[%s3453_s5 + $0x20] sm:$0xff] }
  0x31   : > { %v818_v35 = vld [vmem:[%s3454_s6 + $0x60] sm:$0xff] }
  0x33   : > { %2015 = vmatpush1.bf16.msra.mxu0 %v2014_v63  ;;  %v372_v63 = vld [vmem:[%s2588_s11 + $0x38] sm:$0xff] }
  0x34   : > { %2017 = vmatprep.subr.bf16.mxu0 %v2016_v0  ;;  %v473_v0 = vld [vmem:[%s3450_s2 + $0x248] sm:$0xff]  ;;  %v398_v4 = vmul.f32 %v2613_v49, %v372_v63 }
  0x35   : > { %v2052_v8 = vpack.c.bf16 %v475_v1, %v473_v0  ;;  %v883_v63 = vld [vmem:[%s3454_s6 + $0x268] sm:$0xff]  ;;  %v885_v0 = vld [vmem:[%s3454_s6 + $0x278] sm:$0xff] }
  0x37   : > { %2019 = vmatpush1.bf16.msra.mxu0 %v2018_v5  ;;  %v371_v5 = vld [vmem:[%s2588_s11 + $0x30] sm:$0xff] }
  0x38   : > { %2021 = vmatprep.subr.bf16.mxu0 %v2020_v6  ;;  %v386_v6 = vsub.s32 2, %v2571_v33  ;;  %v397_v11 = vmul.f32 %v379_v45, %v371_v5  ;;  %v367_v33 = vld [vmem:[%s2588_s11 + $0x10] sm:$0xff]  ;;  %v2150_v45 = vpack.c.bf16 %v881_v43, %v879_v42  ;;  %v809_v5 = vld [vmem:[%s3454_s6 + $0x18] sm:$0xff]  ;;  %v822_v43 = vld [vmem:[%s3454_s6 + $0x80] sm:$0xff] }
  0x3a   : > { %v387_v49 = vrot.slane %v2609_v48, %v386_v6  ;;  %v370_v48 = vld [vmem:[%s2588_s11 + $0x28] sm:$0xff]  ;;  %s1858_s11 = sshll.u32 %s2555_s21, 1  ;;  %s2285_s21 = smul.u32 768, %s2471_s13 }
  0x3b   : > { %2023 = vmatpush1.bf16.msra.mxu0 %v2022_v12  ;;  %v2054_v12 = vpack.c.bf16 %v474_v10, %v472_v9  ;;  %s364_s15 = scalar_lea.vmem %s3451_s3, %s1858_s11  ;;  %v690_v10 = vld [vmem:[%s3453_s5] sm:$0xff]  ;;  %s3407_s13 = scalar_lea.sflag [#allocation3], %s349_s29 }
  0x3c   : > { %2025 = vmatprep.subr.bf16.mxu0 %v2024_v13  ;;  %v477_v13 = vld [vmem:[%s3450_s2 + $0x268] sm:$0xff]  ;;  %v393_v14 = vmul.f32 %v387_v49, %v367_v33  ;;  %v396_v16 = vmul.f32 %v387_v49, %v370_v48  ;;  %v654_v28 = vld [vmem:[%s364_s15] sm:$0x3]  ;;  %v808_v33 = vld [vmem:[%s3454_s6 + $0x10] sm:$0xff]  ;;  %s3404_s18 = scalar_lea.hbm %s3457_s9, %s2285_s21  ;;  %s2330_s11 = scalar_lea.vmem %s3399_s23, 768 }
  0x3d   : > { %v691_v48 = vld [vmem:[%s3453_s5 + $0x8] sm:$0xff]  ;;  %p2331_p11 = scmp.ne.s32.totalorder %s3399_s23, %s2330_s11  ;;  %s2336_s15 = scalar_lea.vmem %s2335_s26, 1536 }
  0x3e   : > { %p2338_p1 = scmp.lt.s32.totalorder %s2336_s15, %s2330_s11 }
  0x3f   : > { %2027 = vmatpush1.bf16.msra.mxu0 %v2026_v18  ;;  %v399_v18 = vmul.f32 %v387_v49, %v373_v17  ;;  %v806_v49 = vld [vmem:[%s3454_s6] sm:$0xff]  ;;  %p2332_p12 = pnand %p2331_p11, %p2488_p5 }
  0x40   : > { %2029 = vmatprep.subr.bf16.mxu0 %v2028_v19  ;;  %v871_v19 = vld [vmem:[%s3454_s6 + $0x208] sm:$0xff]  ;;  %p2339_p2 = por %p2338_p1, %p2337_p0 }
  0x41   : > { %v2140_v21 = vpack.c.bf16 %v873_v20, %v871_v19  ;;  %v810_v19 = vld [vmem:[%s3454_s6 + $0x20] sm:$0xff]  ;;  %v812_v20 = vld [vmem:[%s3454_s6 + $0x30] sm:$0xff]  ;;  %p2333_p13 = pneg %p2332_p12 }
  0x43   : > { %2031 = vmatpush1.bf16.msra.mxu0 %v2030_v24  ;;  %v872_v24 = vld [vmem:[%s3454_s6 + $0x210] sm:$0xff]  ;;  %p2340_p3 = pnand %p2339_p2, %p2333_p13 }
  0x44   : > { %2033 = vmatprep.subr.bf16.mxu0 %v2032_v25  ;;  %v2143_v25 = vpack.c.bf16 %v872_v24, %v870_v23  ;;  %v817_v23 = vld [vmem:[%s3454_s6 + $0x58] sm:$0xff] }
  0x45   : > { %v693_v24 = vld [vmem:[%s3453_s5 + $0x18] sm:$0xff] }
  0x47   : > { %2035 = vmatpush1.bf16.msra.mxu0 %v2034_v30  ;;  %v659_v30 = vrot.slane %v654_v28, %v2713_v37 }
  0x48   : > { %2037 = vmatprep.subr.bf16.mxu0 %v2036_v31  ;;  %v663_v31 = vrot.slane %v654_v28, %v2594_v40  ;;  %v814_v28 = vld [vmem:[%s3454_s6 + $0x40] sm:$0xff] }
  0x4b   : > { %2039 = vmatpush1.bf16.msra.mxu0 %v2038_v38 }
  0x4c   : > { %2041 = vmatprep.subr.bf16.mxu0 %v2040_v39 }
  0x4f   : > { %2043 = vmatpush1.bf16.msra.mxu0 %v2042_v46  ;;  %v677_v46 = vrot.slane %v672_v34, %v2713_v37  ;;  %v880_v37 = vld [vmem:[%s3454_s6 + $0x250] sm:$0xff] }
  0x50   : > { %2045 = vmatprep.subr.bf16.mxu0 %v2044_v50  ;;  %v681_v50 = vrot.slane %v672_v34, %v2594_v40  ;;  %v2153_v62 = vpack.c.bf16 %v880_v37, %v878_v59  ;;  %v835_v59 = vld [vmem:[%s3454_s6 + $0xe8] sm:$0xff]  ;;  %v837_v37 = vld [vmem:[%s3454_s6 + $0xf8] sm:$0xff] }
  0x52   : > { %553 = vmatmul.mubr.f32.vlgmr.msra.gmra.mrb[0].mxu0 %v391_v56 }
  0x53   : > { %2047 = vmatpush1.bf16.msra.mxu0 %v2046_v57  ;;  %558 = vmatprep.mubr.f32.mxu0 %v395_v58 }
  0x54   : > { %2049 = vmatprep.subr.bf16.mxu0 %v2048_v60 }
  0x56   : > { %559 = vmatmul.mubr.f32.gmra.mrb[2].mxu0 %v394_v2 }
  0x57   : > { %2051 = vmatpush1.bf16.msra.mxu0 %v2050_v3  ;;  %564 = vmatprep.mubr.f32.mxu0 %v398_v4  ;;  %v2155_v3 = vpack.c.bf16 %v885_v0, %v883_v63  ;;  %v807_v4 = vld [vmem:[%s3454_s6 + $0x8] sm:$0xff]  ;;  %v841_v0 = vld [vmem:[%s3454_s6 + $0x118] sm:$0xff] }
  0x58   : > { %2053 = vmatprep.subr.bf16.mxu0 %v2052_v8  ;;  %v2060_v8 = vpack.c.bf16 %v809_v5, %v807_v4  ;;  %v839_v63 = vld [vmem:[%s3454_s6 + $0x108] sm:$0xff]  ;;  %v840_v4 = vld [vmem:[%s3454_s6 + $0x110] sm:$0xff] }
  0x59   : > { %v843_v5 = vld [vmem:[%s3454_s6 + $0x128] sm:$0xff] }
  0x5a   : > { %565 = vmatmul.mubr.f32.gmra.mrb[4].mxu0 %v397_v11  ;;  %v882_v11 = vld [vmem:[%s3454_s6 + $0x260] sm:$0xff] }
  0x5b   : > { %2055 = vmatpush1.bf16.msra.mxu0 %v2054_v12  ;;  %635 = vmatprep.mubr.f32.mxu0 %v2394_v7  ;;  %v884_v12 = vld [vmem:[%s3454_s6 + $0x270] sm:$0xff] }
  0x5c   : > { %583 = vmatprep.subr.mxu0 %v477_v13  ;;  %v2158_v13 = vpack.c.bf16 %v884_v12, %v882_v11  ;;  %v844_v11 = vld [vmem:[%s3454_s6 + $0x130] sm:$0xff]  ;;  %v847_v12 = vld [vmem:[%s3454_s6 + $0x148] sm:$0xff] }
  0x5f   : > { %584 = vmatpush1.msra.mxu0 %v476_v15  ;;  %v813_v15 = vld [vmem:[%s3454_s6 + $0x38] sm:$0xff] }
  0x60   : > { %1859 = vmatmul.mubr.msk.f32.vlgmr.msra.gmra.mrb[0].mxu0 %vm478_vm0, %v393_v14  ;;  %2142 = vmatprep.subr.msk.bf16.mxu0 %vm2788_vm2, %v2140_v21  ;;  %v811_v14 = vld [vmem:[%s3454_s6 + $0x28] sm:$0xff] }
  0x61   : > { %641 = vmatprep.mubr.f32.mxu0 %v2394_v7  ;;  %v2065_v17 = vpack.c.bf16 %v813_v15, %v811_v14  ;;  %v815_v21 = vld [vmem:[%s3454_s6 + $0x48] sm:$0xff]  ;;  %v846_v14 = vld [vmem:[%s3454_s6 + $0x140] sm:$0xff]  ;;  %v848_v15 = vld [vmem:[%s3454_s6 + $0x150] sm:$0xff] }
  0x62   : > { %v2070_v26 = vpack.c.bf16 %v817_v23, %v815_v21  ;;  %v855_v21 = vld [vmem:[%s3454_s6 + $0x188] sm:$0xff]  ;;  %v857_v23 = vld [vmem:[%s3454_s6 + $0x198] sm:$0xff] }
  0x64   : > { %1860 = vmatmul.mubr.msk.f32.gmra.mrb[2].mxu0 %vm478_vm0, %v396_v16  ;;  %v2063_v16 = vpack.c.bf16 %v808_v33, %v806_v49  ;;  %v849_v49 = vld [vmem:[%s3454_s6 + $0x158] sm:$0xff] }
  0x65   : > { %647 = vmatprep.mubr.f32.mxu0 %v2394_v7 }
  0x66   : > { %2144 = vmatpush1.bf16.xpose.msra.mxu0 %v2143_v25  ;;  %v2068_v25 = vpack.c.bf16 %v812_v20, %v810_v19  ;;  %v850_v19 = vld [vmem:[%s3454_s6 + $0x160] sm:$0xff]  ;;  %v852_v20 = vld [vmem:[%s3454_s6 + $0x170] sm:$0xff] }
  0x67   : > { %2147 = vmatprep.subr.msk.bf16.mxu0 %vm2788_vm2, %v2145_v29  ;;  %v816_v29 = vld [vmem:[%s3454_s6 + $0x50] sm:$0xff] }
  0x68   : > { %1861 = vmatmul.mubr.msk.f32.gmra.mrb[4].mxu0 %vm478_vm0, %v399_v18  ;;  %v692_v18 = vld [vmem:[%s3453_s5 + $0x10] sm:$0xff] }
  0x6e   : > { %2149 = vmatpush1.bf16.xpose.msra.mxu0 %v2148_v41  ;;  %v2078_v41 = vpack.c.bf16 %v820_v36, %v818_v35  ;;  %v863_v35 = vld [vmem:[%s3454_s6 + $0x1c8] sm:$0xff]  ;;  %v865_v36 = vld [vmem:[%s3454_s6 + $0x1d8] sm:$0xff] }
  0x6f   : > { %2152 = vmatprep.subr.msk.bf16.mxu0 %vm2788_vm2, %v2150_v45  ;;  %v827_v45 = vld [vmem:[%s3454_s6 + $0xa8] sm:$0xff] }
  0x76   : > { %2154 = vmatpush1.bf16.xpose.msra.mxu0 %v2153_v62  ;;  %v836_v62 = vld [vmem:[%s3454_s6 + $0xf0] sm:$0xff] }
  0x77   : > { %2157 = vmatprep.subr.msk.bf16.mxu0 %vm2788_vm2, %v2155_v3  ;;  %v838_v3 = vld [vmem:[%s3454_s6 + $0x100] sm:$0xff] }
  0x7e   : > { %2159 = vmatpush1.bf16.xpose.msra.mxu0 %v2158_v13  ;;  %v2110_v13 = vpack.c.bf16 %v849_v49, %v847_v12  ;;  %v1460_v49 = vld [vmem:[%s3456_s8 + $0x100] sm:$0xff] }
 0x133   : > { %v637_v32 = vpop.f32.mrb[0].mxu0 }
 0x134   : > { %v666_v38 = vmul.f32 %v659_v30, %v637_v32  ;;  %v639_v39 = vpop.f32.mrb[1].mxu0  ;;  %v2073_v32 = vpack.c.bf16 %v816_v29, %v814_v28  ;;  %v859_v28 = vld [vmem:[%s3454_s6 + $0x1a8] sm:$0xff]  ;;  %v861_v29 = vld [vmem:[%s3454_s6 + $0x1b8] sm:$0xff] }
 0x135   : > { %v667_v44 = vmul.f32 %v663_v31, %v639_v39  ;;  %v825_v39 = vld [vmem:[%s3454_s6 + $0x98] sm:$0xff] }
 0x136   : > { %v684_v54 = vadd.f32 %v677_v46, %v666_v38  ;;  %v823_v38 = vld [vmem:[%s3454_s6 + $0x88] sm:$0xff] }
 0x137   : > { %v643_v47 = vpop.f32.mrb[2].mxu0  ;;  %v685_v57 = vadd.f32 %v681_v50, %v667_v44  ;;  %v2080_v42 = vpack.c.bf16 %v825_v39, %v823_v38  ;;  %v824_v44 = vld [vmem:[%s3454_s6 + $0x90] sm:$0xff]  ;;  %v2130_v39 = vpack.c.bf16 %v865_v36, %v863_v35 }
 0x138   : > { %v668_v51 = vmul.f32 %v659_v30, %v643_v47  ;;  %v645_v52 = vpop.f32.mrb[3].mxu0  ;;  %v2083_v47 = vpack.c.bf16 %v824_v44, %v822_v43  ;;  %v867_v43 = vld [vmem:[%s3454_s6 + $0x1e8] sm:$0xff]  ;;  %v869_v44 = vld [vmem:[%s3454_s6 + $0x1f8] sm:$0xff] }
 0x139   : > { %v669_v53 = vmul.f32 %v663_v31, %v645_v52  ;;  %v828_v52 = vld [vmem:[%s3454_s6 + $0xb0] sm:$0xff] }
 0x13a   : > { %v686_v55 = vadd.f32 %v677_v46, %v668_v51  ;;  %v826_v51 = vld [vmem:[%s3454_s6 + $0xa0] sm:$0xff] }
 0x13b   : > { %v649_v56 = vpop.f32.mrb[4].mxu0  ;;  %v687_v58 = vadd.f32 %v681_v50, %v669_v53  ;;  %v831_v53 = vld [vmem:[%s3454_s6 + $0xc8] sm:$0xff] }
 0x13c   : > { %v670_v40 = vmul.f32 %v659_v30, %v649_v56  ;;  %v651_v60 = vpop.f32.mrb[5].mxu0  ;;  %v2058_v61 = vpack.c.bf16 %v686_v55, %v684_v54  ;;  %v819_v30 = vld [vmem:[%s3454_s6 + $0x68] sm:$0xff]  ;;  %v833_v54 = vld [vmem:[%s3454_s6 + $0xd8] sm:$0xff]  ;;  %v2088_v55 = vpack.c.bf16 %v828_v52, %v826_v51 }
 0x13d   : > { %v671_v1 = vmul.f32 %v663_v31, %v651_v60  ;;  %v2056_v2 = vpack.c.bf16 %v687_v58, %v685_v57  ;;  %v821_v31 = vld [vmem:[%s3454_s6 + $0x78] sm:$0xff]  ;;  %v2090_v56 = vpack.c.bf16 %v833_v54, %v831_v53  ;;  %v830_v57 = vld [vmem:[%s3454_s6 + $0xc0] sm:$0xff]  ;;  %v832_v58 = vld [vmem:[%s3454_s6 + $0xd0] sm:$0xff]  ;;  %v2095_v60 = vpack.c.bf16 %v837_v37, %v835_v59 }
 0x13e   : > { %v688_v9 = vadd.f32 %v677_v46, %v670_v40  ;;  %v2075_v34 = vpack.c.bf16 %v821_v31, %v819_v30  ;;  %v829_v46 = vld [vmem:[%s3454_s6 + $0xb8] sm:$0xff]  ;;  %v2093_v40 = vpack.c.bf16 %v832_v58, %v830_v57  ;;  %v2125_v31 = vpack.c.bf16 %v861_v29, %v859_v28 }
 0x13f   : > { %v689_v6 = vadd.f32 %v681_v50, %v671_v1  ;;  %2057 = vmatprep.subr.bf16.mxu1 %v2056_v2  ;;  %v2085_v50 = vpack.c.bf16 %v829_v46, %v827_v45  ;;  %v2100_v2 = vpack.c.bf16 %v841_v0, %v839_v63  ;;  %v2135_v46 = vpack.c.bf16 %v869_v44, %v867_v43  ;;  %v1436_v0 = vld [vmem:[%s3456_s8 + $0x40] sm:$0xff] }
 0x140   : > { %2059 = vmatpush1.bf16.msra.mxu1 %v2058_v61  ;;  %v834_v61 = vld [vmem:[%s3454_s6 + $0xe0] sm:$0xff] }
 0x141   : > { %715 = vmatprep.subr.mxu1 %v689_v6  ;;  %v2098_v1 = vpack.c.bf16 %v836_v62, %v834_v61  ;;  %v845_v6 = vld [vmem:[%s3454_s6 + $0x138] sm:$0xff]  ;;  %v1430_v61 = vld [vmem:[%s3456_s8 + $0x10] sm:$0xff]  ;;  %v1433_v62 = vld [vmem:[%s3456_s8 + $0x28] sm:$0xff] }
 0x142   : > { %v2223_v63 = vpack.c.bf16 %v1433_v62, %v1430_v61 }
 0x144   : > { %716 = vmatpush1.msra.mxu1 %v688_v9  ;;  %v2105_v9 = vpack.c.bf16 %v845_v6, %v843_v5  ;;  %v1448_v6 = vld [vmem:[%s3456_s8 + $0xa0] sm:$0xff] }
 0x145   : > { %1862 = vmatmul.mubr.msk.f32.vlgmr.msra.gmra.mrb[0].mxu1 %vm695_vm3, %v690_v10  ;;  %2062 = vmatprep.subr.msk.bf16.mxu1 %vm2788_vm2, %v2060_v8  ;;  %v2103_v8 = vpack.c.bf16 %v840_v4, %v838_v3  ;;  %v842_v10 = vld [vmem:[%s3454_s6 + $0x120] sm:$0xff]  ;;  %v1442_v3 = vld [vmem:[%s3456_s8 + $0x70] sm:$0xff]  ;;  %v1445_v4 = vld [vmem:[%s3456_s8 + $0x88] sm:$0xff] }
 0x146   : > { %781 = vmatprep.mubr.f32.mxu1 %v2394_v7  ;;  %v2108_v33 = vpack.c.bf16 %v844_v11, %v842_v10  ;;  %v2231_v5 = vpack.c.bf16 %v1445_v4, %v1442_v3  ;;  %v1454_v10 = vld [vmem:[%s3456_s8 + $0xd0] sm:$0xff]  ;;  %v1457_v11 = vld [vmem:[%s3456_s8 + $0xe8] sm:$0xff] }
 0x147   : > { %v2239_v12 = vpack.c.bf16 %v1457_v11, %v1454_v10 }
 0x149   : > { %1863 = vmatmul.mubr.msk.f32.gmra.mrb[2].mxu1 %vm695_vm3, %v691_v48  ;;  %v851_v48 = vld [vmem:[%s3454_s6 + $0x168] sm:$0xff] }
 0x14a   : > { %787 = vmatprep.mubr.f32.mxu1 %v2394_v7 }
 0x14b   : > { %2064 = vmatpush1.bf16.xpose.msra.mxu1 %v2063_v16  ;;  %v853_v16 = vld [vmem:[%s3454_s6 + $0x178] sm:$0xff] }
 0x14c   : > { %2067 = vmatprep.subr.msk.bf16.mxu1 %vm2788_vm2, %v2065_v17  ;;  %v2113_v17 = vpack.c.bf16 %v848_v15, %v846_v14  ;;  %v1466_v14 = vld [vmem:[%s3456_s8 + $0x130] sm:$0xff]  ;;  %v1469_v15 = vld [vmem:[%s3456_s8 + $0x148] sm:$0xff] }
 0x14d   : > { %1864 = vmatmul.mubr.msk.f32.gmra.mrb[4].mxu1 %vm695_vm3, %v692_v18  ;;  %v2115_v18 = vpack.c.bf16 %v853_v16, %v851_v48  ;;  %v2247_v48 = vpack.c.bf16 %v1469_v15, %v1466_v14  ;;  %v1472_v16 = vld [vmem:[%s3456_s8 + $0x160] sm:$0xff] }
 0x14e   : > { %793 = vmatprep.mubr.f32.mxu1 %v2394_v7 }
 0x151   : > { %1865 = vmatmul.mubr.msk.f32.gmra.mrb[6].mxu1 %vm695_vm3, %v693_v24  ;;  %v2118_v24 = vpack.c.bf16 %v852_v20, %v850_v19  ;;  %v1478_v19 = vld [vmem:[%s3456_s8 + $0x190] sm:$0xff]  ;;  %v1481_v20 = vld [vmem:[%s3456_s8 + $0x1a8] sm:$0xff] }
 0x152   : > { %799 = vmatprep.mubr.f32.mxu1 %v2394_v7 }
 0x153   : > { %2069 = vmatpush1.bf16.xpose.msra.mxu1 %v2068_v25  ;;  %v2120_v25 = vpack.c.bf16 %v857_v23, %v855_v21  ;;  %v2255_v21 = vpack.c.bf16 %v1481_v20, %v1478_v19  ;;  %v1484_v23 = vld [vmem:[%s3456_s8 + $0x1c0] sm:$0xff] }
 0x154   : > { %2072 = vmatprep.subr.msk.bf16.mxu1 %vm2788_vm2, %v2070_v26  ;;  %v854_v26 = vld [vmem:[%s3454_s6 + $0x180] sm:$0xff] }
 0x155   : > { %1866 = vmatmul.mubr.msk.f32.gmra.mrb[8].mxu1 %vm695_vm3, %v694_v27  ;;  %v856_v27 = vld [vmem:[%s3454_s6 + $0x190] sm:$0xff]  ;;  %v1252_v20 = vld [vmem:[%s3455_s7] sm:$0xff] }
 0x156   : > { %v2123_v30 = vpack.c.bf16 %v856_v27, %v854_v26  ;;  %v1490_v26 = vld [vmem:[%s3456_s8 + $0x1f0] sm:$0xff]  ;;  %v1493_v27 = vld [vmem:[%s3456_s8 + $0x208] sm:$0xff] }
 0x157   : > { %v2263_v28 = vpack.c.bf16 %v1493_v27, %v1490_v26  ;;  %v1254_v27 = vld [vmem:[%s3455_s7 + $0x10] sm:$0xff] }
 0x15b   : > { %2074 = vmatpush1.bf16.xpose.msra.mxu1 %v2073_v32  ;;  %v858_v32 = vld [vmem:[%s3454_s6 + $0x1a0] sm:$0xff] }
 0x15c   : > { %2077 = vmatprep.subr.msk.bf16.mxu1 %vm2788_vm2, %v2075_v34  ;;  %v860_v34 = vld [vmem:[%s3454_s6 + $0x1b0] sm:$0xff] }
 0x15d   : > { %v2128_v38 = vpack.c.bf16 %v860_v34, %v858_v32 }
 0x163   : > { %2079 = vmatpush1.bf16.xpose.msra.mxu1 %v2078_v41  ;;  %v862_v41 = vld [vmem:[%s3454_s6 + $0x1c0] sm:$0xff] }
 0x164   : > { %2082 = vmatprep.subr.msk.bf16.mxu1 %vm2788_vm2, %v2080_v42  ;;  %v864_v42 = vld [vmem:[%s3454_s6 + $0x1d0] sm:$0xff] }
 0x165   : > { %v2133_v45 = vpack.c.bf16 %v864_v42, %v862_v41 }
 0x16b   : > { %2084 = vmatpush1.bf16.xpose.msra.mxu1 %v2083_v47  ;;  %v866_v47 = vld [vmem:[%s3454_s6 + $0x1e0] sm:$0xff] }
 0x16c   : > { %2087 = vmatprep.subr.msk.bf16.mxu1 %vm2788_vm2, %v2085_v50  ;;  %v868_v50 = vld [vmem:[%s3454_s6 + $0x1f0] sm:$0xff] }
 0x16d   : > { %v2138_v51 = vpack.c.bf16 %v868_v50, %v866_v47 }
 0x173   : > { %2089 = vmatpush1.bf16.xpose.msra.mxu1 %v2088_v55 }
 0x174   : > { %2092 = vmatprep.subr.msk.bf16.mxu1 %vm2788_vm2, %v2090_v56 }
 0x17b   : > { %2094 = vmatpush1.bf16.xpose.msra.mxu1 %v2093_v40 }
 0x17c   : > { %2097 = vmatprep.subr.msk.bf16.mxu1 %vm2788_vm2, %v2095_v60  ;;  %v2395_v60 = vmov 0.0|0.0  }
 0x183   : > { %2099 = vmatpush1.bf16.xpose.msra.mxu1 %v2098_v1  ;;  %v1439_v1 = vld [vmem:[%s3456_s8 + $0x58] sm:$0xff] }
 0x184   : > { %2102 = vmatprep.subr.msk.bf16.mxu1 %vm2788_vm2, %v2100_v2  ;;  %v2227_v2 = vpack.c.bf16 %v1439_v1, %v1436_v0 }
 0x18b   : > { %2104 = vmatpush1.bf16.xpose.msra.mxu1 %v2103_v8  ;;  %v1451_v8 = vld [vmem:[%s3456_s8 + $0xb8] sm:$0xff] }
 0x18c   : > { %2107 = vmatprep.subr.msk.bf16.mxu1 %vm2788_vm2, %v2105_v9  ;;  %v2235_v9 = vpack.c.bf16 %v1451_v8, %v1448_v6 }
 0x193   : > { %2109 = vmatpush1.bf16.xpose.msra.mxu1 %v2108_v33  ;;  %v1463_v33 = vld [vmem:[%s3456_s8 + $0x118] sm:$0xff] }
 0x194   : > { %2112 = vmatprep.subr.msk.bf16.mxu1 %vm2788_vm2, %v2110_v13  ;;  %v2243_v13 = vpack.c.bf16 %v1463_v33, %v1460_v49 }
 0x19b   : > { %2114 = vmatpush1.bf16.xpose.msra.mxu1 %v2113_v17  ;;  %v1475_v17 = vld [vmem:[%s3456_s8 + $0x178] sm:$0xff] }
 0x19c   : > { %2117 = vmatprep.subr.msk.bf16.mxu1 %vm2788_vm2, %v2115_v18  ;;  %v2251_v18 = vpack.c.bf16 %v1475_v17, %v1472_v16 }
 0x1a3   : > { %2119 = vmatpush1.bf16.xpose.msra.mxu1 %v2118_v24  ;;  %v1487_v24 = vld [vmem:[%s3456_s8 + $0x1d8] sm:$0xff] }
 0x1a4   : > { %2122 = vmatprep.subr.msk.bf16.mxu1 %vm2788_vm2, %v2120_v25  ;;  %v2259_v25 = vpack.c.bf16 %v1487_v24, %v1484_v23  ;;  %v1253_v23 = vld [vmem:[%s3455_s7 + $0x8] sm:$0xff] }
 0x1a5   : > { %v1429_v24 = vld [vmem:[%s3456_s8 + $0x8] sm:$0xff] }
 0x1ab   : > { %2124 = vmatpush1.bf16.xpose.msra.mxu1 %v2123_v30 }
 0x1ac   : > { %2127 = vmatprep.subr.msk.bf16.mxu1 %vm2788_vm2, %v2125_v31 }
 0x1b3   : > { %2129 = vmatpush1.bf16.xpose.msra.mxu1 %v2128_v38 }
 0x1b4   : > { %2132 = vmatprep.subr.msk.bf16.mxu1 %vm2788_vm2, %v2130_v39 }
 0x1bb   : > { %2134 = vmatpush1.bf16.xpose.msra.mxu1 %v2133_v45 }
 0x1bc   : > { %2137 = vmatprep.subr.msk.bf16.mxu1 %vm2788_vm2, %v2135_v46 }
 0x1c3   : > { %2139 = vmatpush1.bf16.xpose.msra.mxu1 %v2138_v51 }
 0x1c4   : > { %2222 = vmatprep.subr.bf16.mxu1 %v2395_v60 }
 0x218   : > { %v777_v52 = vpop.f32.mrb[0].mxu1 }
 0x219   : > { %v779_v53 = vpop.f32.mrb[1].mxu1 }
 0x21a   : > { %1899 = vmatprep.mubr.msk.f32.mxu1 %vm886_vm1, %v779_v53  ;;  %1912 = vmatprep.mubr.msk.f32.mxu0 %vm886_vm1, %v779_v53 }
 0x21b   : > { %1087 = vmatmul.mubr.f32.vlgmr.msra.gmra.mrb[10].mxu1 %v777_v52  ;;  %1182 = vmatmul.mubr.f32.vlgmr.msra.gmra.mrb[6].mxu0 %v777_v52 }
 0x21c   : > { %v783_v54 = vpop.f32.mrb[2].mxu1  ;;  %2225 = vmatpush1.bf16.xpose.msk.msra.mxu1 %vm2788_vm2, %v2223_v63 }
 0x21d   : > { %v785_v55 = vpop.f32.mrb[3].mxu1  ;;  %2226 = vmatprep.subr.bf16.mxu1 %v2395_v60 }
 0x21e   : > { %1900 = vmatprep.mubr.msk.f32.mxu1 %vm886_vm1, %v785_v55  ;;  %1913 = vmatprep.mubr.msk.f32.mxu0 %vm886_vm1, %v785_v55 }
 0x21f   : > { %1093 = vmatmul.mubr.f32.gmra.mrb[12].mxu1 %v783_v54  ;;  %1187 = vmatmul.mubr.f32.gmra.mrb[8].mxu0 %v783_v54 }
 0x220   : > { %v789_v56 = vpop.f32.mrb[4].mxu1 }
 0x221   : > { %v791_v57 = vpop.f32.mrb[5].mxu1 }
 0x222   : > { %1901 = vmatprep.mubr.msk.f32.mxu1 %vm886_vm1, %v791_v57  ;;  %1914 = vmatprep.mubr.msk.f32.mxu0 %vm886_vm1, %v791_v57 }
 0x223   : > { %1099 = vmatmul.mubr.f32.gmra.mrb[14].mxu1 %v789_v56  ;;  %1192 = vmatmul.mubr.f32.gmra.mrb[10].mxu0 %v789_v56 }
 0x224   : > { %v795_v58 = vpop.f32.mrb[6].mxu1  ;;  %2229 = vmatpush1.bf16.xpose.msk.msra.mxu1 %vm2788_vm2, %v2227_v2 }
 0x225   : > { %v797_v59 = vpop.f32.mrb[7].mxu1  ;;  %2230 = vmatprep.subr.bf16.mxu1 %v2395_v60 }
 0x226   : > { %1902 = vmatprep.mubr.msk.f32.mxu1 %vm886_vm1, %v797_v59  ;;  %1915 = vmatprep.mubr.msk.f32.mxu0 %vm886_vm1, %v797_v59 }
 0x227   : > { %1105 = vmatmul.mubr.f32.gmra.mrb[16].mxu1 %v795_v58  ;;  %1197 = vmatmul.mubr.f32.gmra.mrb[12].mxu0 %v795_v58 }
 0x228   : > { %v801_v37 = vpop.f32.mrb[8].mxu1 }
 0x229   : > { %v803_v40 = vpop.f32.mrb[9].mxu1 }
 0x22a   : > { %1903 = vmatprep.mubr.msk.f32.mxu1 %vm886_vm1, %v803_v40  ;;  %1916 = vmatprep.mubr.msk.f32.mxu0 %vm886_vm1, %v803_v40 }
 0x22b   : > { %1111 = vmatmul.mubr.f32.gmra.mrb[18].mxu1 %v801_v37  ;;  %1202 = vmatmul.mubr.f32.gmra.mrb[14].mxu0 %v801_v37 }
 0x22c   : > { %1329 = vmatprep.mubr.f32.mxu0 %v2394_v7  ;;  %1728 = vmatprep.mubr.f32.mxu1 %v2394_v7 }
 0x22d   : > { %2233 = vmatpush1.bf16.xpose.msk.msra.mxu1 %vm2788_vm2, %v2231_v5 }
 0x22e   : > { %2234 = vmatprep.subr.bf16.mxu1 %v2395_v60 }
 0x235   : > { %2237 = vmatpush1.bf16.xpose.msk.msra.mxu1 %vm2788_vm2, %v2235_v9 }
 0x236   : > { %2238 = vmatprep.subr.bf16.mxu1 %v2395_v60 }
 0x23d   : > { %2241 = vmatpush1.bf16.xpose.msk.msra.mxu1 %vm2788_vm2, %v2239_v12 }
 0x23e   : > { %2242 = vmatprep.subr.bf16.mxu1 %v2395_v60 }
 0x245   : > { %2245 = vmatpush1.bf16.xpose.msk.msra.mxu1 %vm2788_vm2, %v2243_v13 }
 0x246   : > { %2246 = vmatprep.subr.bf16.mxu1 %v2395_v60 }
 0x24d   : > { %2249 = vmatpush1.bf16.xpose.msk.msra.mxu1 %vm2788_vm2, %v2247_v48 }
 0x24e   : > { %2250 = vmatprep.subr.bf16.mxu1 %v2395_v60 }
 0x255   : > { %2253 = vmatpush1.bf16.xpose.msk.msra.mxu1 %vm2788_vm2, %v2251_v18 }
 0x256   : > { %2254 = vmatprep.subr.bf16.mxu1 %v2395_v60 }
 0x25d   : > { %2257 = vmatpush1.bf16.xpose.msk.msra.mxu1 %vm2788_vm2, %v2255_v21 }
 0x25e   : > { %2258 = vmatprep.subr.bf16.mxu1 %v2395_v60 }
 0x265   : > { %2261 = vmatpush1.bf16.xpose.msk.msra.mxu1 %vm2788_vm2, %v2259_v25  ;;  %v1432_v25 = vld [vmem:[%s3456_s8 + $0x20] sm:$0xff] }
 0x266   : > { %2262 = vmatprep.subr.bf16.mxu1 %v2395_v60 }
 0x26d   : > { %2265 = vmatpush1.bf16.xpose.msk.msra.mxu1 %vm2788_vm2, %v2263_v28 }
 0x26e   : > { %2266 = vmatprep.subr.bf16.mxu1 %v2395_v60 }
 0x2ee   : > { %v1088_v29 = vpop.f32.mrb[10].mxu1  ;;  %v1183_v30 = vpop.f32.mrb[6].mxu0 }
 0x2ef   : > { %v1090_v31 = vpop.f32.mrb[11].mxu1  ;;  %v1185_v32 = vpop.f32.mrb[7].mxu0  ;;  %vm1207_vm4 = vcmp.ge.f32.partialorder %v1088_v29, 0.0  ;;  %v1222_v34 = vmul.f32 0.2, %v1088_v29  ;;  %vm1209_vm5 = vcmp.ge.f32.partialorder %v1183_v30, 0.0 }
 0x2f0   : > { %v1224_v35 = vmul.f32 0.2, %v1183_v30  ;;  %v1223_v36 = vmul.f32 0.2, %v1090_v31  ;;  %vm1208_vm8 = vcmp.ge.f32.partialorder %v1090_v31, 0.0  ;;  %v1438_v32 = vld [vmem:[%s3456_s8 + $0x50] sm:$0xff] }
 0x2f1   : > { %v1237_v46 = vsel %vm1207_vm4, %v1088_v29, %v1222_v34  ;;  %vm1255_vm4 = vcmask 326656   ;;  %v1428_v29 = vld [vmem:[%s3456_s8] sm:$0xff] }
 0x2f2   : > { %v1094_v38 = vpop.f32.mrb[12].mxu1  ;;  %v1188_v39 = vpop.f32.mrb[8].mxu0  ;;  %v1239_v50 = vsel %vm1209_vm5, %v1183_v30, %v1224_v35  ;;  %v1238_v56 = vsel %vm1208_vm8, %v1090_v31, %v1223_v36  ;;  %v1431_v30 = vld [vmem:[%s3456_s8 + $0x18] sm:$0xff]  ;;  %v1434_v36 = vld [vmem:[%s3456_s8 + $0x30] sm:$0xff] }
 0x2f3   : > { %vm1210_vm6 = vcmp.ge.f32.partialorder %v1094_v38, 0.0  ;;  %v1225_v41 = vmul.f32 0.2, %v1094_v38  ;;  %vm1212_vm7 = vcmp.ge.f32.partialorder %v1188_v39, 0.0  ;;  %v1096_v42 = vpop.f32.mrb[13].mxu1  ;;  %v1190_v43 = vpop.f32.mrb[9].mxu0  ;;  %v2176_v34 = vpack.c.bf16 %v1431_v30, %v1428_v29 }
 0x2f4   : > { %v1227_v44 = vmul.f32 0.2, %v1188_v39  ;;  %vm1211_vm9 = vcmp.ge.f32.partialorder %v1096_v42, 0.0  ;;  %v1226_v45 = vmul.f32 0.2, %v1096_v42  ;;  %v1435_v31 = vld [vmem:[%s3456_s8 + $0x38] sm:$0xff] }
 0x2f5   : > { %v1240_v47 = vsel %vm1210_vm6, %v1094_v38, %v1225_v41  ;;  %vm2396_vm6 = vmmov 0   ;;  %v2178_v35 = vpack.c.bf16 %v1438_v32, %v1435_v31  ;;  %v1437_v38 = vld [vmem:[%s3456_s8 + $0x48] sm:$0xff]  ;;  %v1444_v41 = vld [vmem:[%s3456_s8 + $0x80] sm:$0xff]  ;;  %v1491_v31 = vld [vmem:[%s3456_s8 + $0x1f8] sm:$0xff] }
 0x2f6   : > { %v2162_v51 = vpack.c.bf16 %v1240_v47, %v1237_v46  ;;  %v1242_v52 = vsel %vm1212_vm7, %v1188_v39, %v1227_v44  ;;  %v1241_v53 = vsel %vm1211_vm9, %v1096_v42, %v1226_v45  ;;  %v1100_v54 = vpop.f32.mrb[14].mxu1  ;;  %v1193_v55 = vpop.f32.mrb[10].mxu0  ;;  %v1441_v39 = vld [vmem:[%s3456_s8 + $0x68] sm:$0xff]  ;;  %v2180_v42 = vpack.c.bf16 %v1437_v38, %v1434_v36  ;;  %v1440_v44 = vld [vmem:[%s3456_s8 + $0x60] sm:$0xff]  ;;  %v1443_v45 = vld [vmem:[%s3456_s8 + $0x78] sm:$0xff] }
 0x2f7   : > { %v2169_v57 = vpack.c.bf16 %v1242_v52, %v1239_v50  ;;  %v1102_v58 = vpop.f32.mrb[15].mxu1  ;;  %v1195_v59 = vpop.f32.mrb[11].mxu0  ;;  %v1228_v37 = vmul.f32 0.2, %v1100_v54  ;;  %v1230_v40 = vmul.f32 0.2, %v1193_v55  ;;  %v2160_v61 = vpack.c.bf16 %v1241_v53, %v1238_v56 }
 0x2f8   : > { %vm1213_vm10 = vcmp.ge.f32.partialorder %v1100_v54, 0.0  ;;  %vm1215_vm11 = vcmp.ge.f32.partialorder %v1193_v55, 0.0  ;;  %v1229_v62 = vmul.f32 0.2, %v1102_v58  ;;  %vm1214_vm14 = vcmp.ge.f32.partialorder %v1102_v58, 0.0  ;;  %v1447_v46 = vld [vmem:[%s3456_s8 + $0x98] sm:$0xff] }
 0x2f9   : > { %2161 = vmatprep.subr.bf16.mxu0 %v2160_v61  ;;  %v1243_v3 = vsel %vm1213_vm10, %v1100_v54, %v1228_v37  ;;  %v1245_v4 = vsel %vm1215_vm11, %v1193_v55, %v1230_v40  ;;  %v2182_v43 = vpack.c.bf16 %v1444_v41, %v1441_v39  ;;  %v1450_v47 = vld [vmem:[%s3456_s8 + $0xb0] sm:$0xff]  ;;  %v2184_v50 = vpack.c.bf16 %v1443_v45, %v1440_v44  ;;  %v1449_v53 = vld [vmem:[%s3456_s8 + $0xa8] sm:$0xff]  ;;  %v1456_v55 = vld [vmem:[%s3456_s8 + $0xe0] sm:$0xff] }
 0x2fa   : > { %v1106_v63 = vpop.f32.mrb[16].mxu1  ;;  %v1198_v0 = vpop.f32.mrb[12].mxu0  ;;  %2163 = vmatpush1.bf16.msra.mxu0 %v2162_v51  ;;  %v1244_v13 = vsel %vm1214_vm14, %v1102_v58, %v1229_v62  ;;  %v2186_v51 = vpack.c.bf16 %v1450_v47, %v1447_v46  ;;  %v1446_v52 = vld [vmem:[%s3456_s8 + $0x90] sm:$0xff]  ;;  %v1453_v54 = vld [vmem:[%s3456_s8 + $0xc8] sm:$0xff]  ;;  %v1452_v58 = vld [vmem:[%s3456_s8 + $0xc0] sm:$0xff] }
 0x2fb   : > { %vm1216_vm12 = vcmp.ge.f32.partialorder %v1106_v63, 0.0  ;;  %v1231_v1 = vmul.f32 0.2, %v1106_v63  ;;  %vm1218_vm13 = vcmp.ge.f32.partialorder %v1198_v0, 0.0  ;;  %v1233_v2 = vmul.f32 0.2, %v1198_v0 }
 0x2fc   : > { %v1108_v5 = vpop.f32.mrb[17].mxu1  ;;  %v1200_v6 = vpop.f32.mrb[13].mxu0  ;;  %v2188_v56 = vpack.c.bf16 %v1449_v53, %v1446_v52  ;;  %v1455_v59 = vld [vmem:[%s3456_s8 + $0xd8] sm:$0xff]  ;;  %v1462_v40 = vld [vmem:[%s3456_s8 + $0x110] sm:$0xff]  ;;  %v1488_v30 = vld [vmem:[%s3456_s8 + $0x1e0] sm:$0xff] }
 0x2fd   : > { %v1246_v8 = vsel %vm1216_vm12, %v1106_v63, %v1231_v1  ;;  %v1248_v9 = vsel %vm1218_vm13, %v1198_v0, %v1233_v2  ;;  %vm1217_vm15 = vcmp.ge.f32.partialorder %v1108_v5, 0.0  ;;  %v1232_v10 = vmul.f32 0.2, %v1108_v5  ;;  %v1459_v37 = vld [vmem:[%s3456_s8 + $0xf8] sm:$0xff]  ;;  %v1458_v63 = vld [vmem:[%s3456_s8 + $0xf0] sm:$0xff]  ;;  %v1461_v0 = vld [vmem:[%s3456_s8 + $0x108] sm:$0xff] }
 0x2fe   : > { %v2166_v11 = vpack.c.bf16 %v1246_v8, %v1243_v3  ;;  %v2172_v12 = vpack.c.bf16 %v1248_v9, %v1245_v4  ;;  %v1112_v49 = vpop.f32.mrb[18].mxu1  ;;  %v1203_v33 = vpop.f32.mrb[14].mxu0  ;;  %v2192_v61 = vpack.c.bf16 %v1455_v59, %v1452_v58  ;;  %v2194_v62 = vpack.c.bf16 %v1462_v40, %v1459_v37  ;;  %v1465_v1 = vld [vmem:[%s3456_s8 + $0x128] sm:$0xff]  ;;  %v1468_v2 = vld [vmem:[%s3456_s8 + $0x140] sm:$0xff]  ;;  %v1467_v6 = vld [vmem:[%s3456_s8 + $0x138] sm:$0xff] }
 0x2ff   : > { %v1247_v14 = vsel %vm1217_vm15, %v1108_v5, %v1232_v10  ;;  %v1114_v15 = vpop.f32.mrb[19].mxu1  ;;  %v1205_v48 = vpop.f32.mrb[15].mxu0  ;;  %v1234_v18 = vmul.f32 0.2, %v1112_v49  ;;  %vm1219_vm3 = vcmp.ge.f32.partialorder %v1112_v49, 0.0  ;;  %vm1221_vm5 = vcmp.ge.f32.partialorder %v1203_v33, 0.0 }
 0x300   : > { %vm1220_vm0 = vcmp.ge.f32.partialorder %v1114_v15, 0.0  ;;  %v1235_v16 = vmul.f32 0.2, %v1114_v15  ;;  %v2164_v17 = vpack.c.bf16 %v1247_v14, %v1244_v13  ;;  %v1236_v26 = vmul.f32 0.2, %v1203_v33  ;;  %v1464_v5 = vld [vmem:[%s3456_s8 + $0x120] sm:$0xff] }
 0x301   : > { %v1249_v21 = vsel %vm1219_vm3, %v1112_v49, %v1234_v18  ;;  %v2196_v3 = vpack.c.bf16 %v1461_v0, %v1458_v63  ;;  %v2198_v4 = vpack.c.bf16 %v1468_v2, %v1465_v1  ;;  %v1471_v8 = vld [vmem:[%s3456_s8 + $0x158] sm:$0xff]  ;;  %v1474_v9 = vld [vmem:[%s3456_s8 + $0x170] sm:$0xff]  ;;  %v2200_v10 = vpack.c.bf16 %v1467_v6, %v1464_v5  ;;  %v1473_v49 = vld [vmem:[%s3456_s8 + $0x168] sm:$0xff] }
 0x302   : > { %2165 = vmatprep.subr.bf16.mxu0 %v2164_v17  ;;  %v1250_v19 = vsel %vm1220_vm0, %v1114_v15, %v1235_v16  ;;  %v1251_v28 = vsel %vm1221_vm5, %v1203_v33, %v1236_v26  ;;  %v1477_v33 = vld [vmem:[%s3456_s8 + $0x188] sm:$0xff]  ;;  %v1480_v13 = vld [vmem:[%s3456_s8 + $0x1a0] sm:$0xff]  ;;  %v1479_v16 = vld [vmem:[%s3456_s8 + $0x198] sm:$0xff]  ;;  %v2216_v22 = vpack.c.bf16 %v1491_v31, %v1488_v30 }
 0x303   : > { %2167 = vmatpush1.bf16.msra.mxu0 %v2166_v11  ;;  %v2202_v11 = vpack.c.bf16 %v1474_v9, %v1471_v8  ;;  %v2206_v15 = vpack.c.bf16 %v1480_v13, %v1477_v33  ;;  %v1476_v48 = vld [vmem:[%s3456_s8 + $0x180] sm:$0xff]  ;;  %v1483_v17 = vld [vmem:[%s3456_s8 + $0x1b8] sm:$0xff]  ;;  %v1486_v18 = vld [vmem:[%s3456_s8 + $0x1d0] sm:$0xff] }
 0x304   : > { %1273 = vmatprep.subr.mxu0 %v1250_v19  ;;  %v2208_v19 = vpack.c.bf16 %v1479_v16, %v1476_v48  ;;  %v1496_v26 = vld [vmem:[%s3456_s8 + $0x220] sm:$0xff]  ;;  %v1495_v32 = vld [vmem:[%s3456_s8 + $0x218] sm:$0xff]  ;;  %v1494_v36 = vld [vmem:[%s3456_s8 + $0x210] sm:$0xff] }
 0x305   : > { %v1497_v38 = vld [vmem:[%s3456_s8 + $0x228] sm:$0xff] }
 0x306   : > { %v2220_v39 = vpack.c.bf16 %v1497_v38, %v1494_v36 }
 0x307   : > { %1274 = vmatpush1.msra.mxu0 %v1249_v21  ;;  %v1482_v21 = vld [vmem:[%s3456_s8 + $0x1b0] sm:$0xff] }
 0x308   : > { %1917 = vmatmul.mubr.msk.f32.vlgmr.msra.gmra.mrb[16].mxu0 %vm1255_vm4, %v1252_v20  ;;  %2168 = vmatprep.subr.bf16.mxu0 %v2395_v60 }
 0x309   : > { %2170 = vmatpush3.bf16.msra.mxu0 %v2169_v57  ;;  %1335 = vmatprep.mubr.f32.mxu0 %v2394_v7  ;;  %v2190_v57 = vpack.c.bf16 %v1456_v55, %v1453_v54 }
 0x30a   : > { %2171 = vmatprep.subr.bf16.mxu0 %v2395_v60  ;;  %v2174_v60 = vpack.c.bf16 %v1432_v25, %v1429_v24  ;;  %v1489_v24 = vld [vmem:[%s3456_s8 + $0x1e8] sm:$0xff]  ;;  %v1492_v25 = vld [vmem:[%s3456_s8 + $0x200] sm:$0xff] }
 0x30b   : > { %v2214_v29 = vpack.c.bf16 %v1492_v25, %v1489_v24 }
 0x30c   : > { %1918 = vmatmul.mubr.msk.f32.gmra.mrb[18].mxu0 %vm1255_vm4, %v1253_v23 }
 0x30d   : > { %2173 = vmatpush3.bf16.msra.mxu0 %v2172_v12  ;;  %1341 = vmatprep.mubr.f32.mxu0 %v2394_v7  ;;  %v1470_v12 = vld [vmem:[%s3456_s8 + $0x150] sm:$0xff] }
 0x30e   : > { %1969 = vmatprep.subr.mxu0 %v2394_v7  ;;  %v2204_v14 = vpack.c.bf16 %v1473_v49, %v1470_v12 }
 0x310   : > { %1919 = vmatmul.mubr.msk.f32.gmra.mrb[20].mxu0 %vm1255_vm4, %v1254_v27 }
 0x311   : > { %1970 = vmatpush3.msra.mxu0 %v1251_v28  ;;  %1971 = vmatprep.mubr.msk.f32.mxu0 %vm2396_vm6, %v2394_v7 }
 0x312   : > { %2175 = vmatprep.subr.bf16.mxu0 %v2174_v60 }
 0x314   : > { %1972 = vmatmul.mubr.msk.f32.vlgmr.msra.gmra.mrb[22].mxu0 %vm1255_vm4, %v1252_v20  ;;  %v2210_v20 = vpack.c.bf16 %v1486_v18, %v1483_v17 }
 0x315   : > { %1974 = vmatprep.mubr.msk.f32.mxu0 %vm2396_vm6, %v2394_v7 }
 0x318   : > { %1975 = vmatmul.mubr.msk.f32.gmra.mrb[24].mxu0 %vm1255_vm4, %v1253_v23  ;;  %v1485_v23 = vld [vmem:[%s3456_s8 + $0x1c8] sm:$0xff] }
 0x319   : > { %1977 = vmatprep.mubr.msk.f32.mxu0 %vm2396_vm6, %v2394_v7  ;;  %2177 = vmatpush1.bf16.xpose.msra.mxu0 %v2176_v34  ;;  %v2212_v60 = vpack.c.bf16 %v1485_v23, %v1482_v21  ;;  %v1498_v34 = vld [vmem:[%s3456_s8 + $0x230] sm:$0xff] }
 0x31a   : > { %2179 = vmatprep.subr.bf16.mxu0 %v2178_v35  ;;  %v2218_v35 = vpack.c.bf16 %v1498_v34, %v1495_v32 }
 0x31c   : > { %1978 = vmatmul.mubr.msk.f32.gmra.mrb[26].mxu0 %vm1255_vm4, %v1254_v27  ;;  %v1499_v27 = vld [vmem:[%s3456_s8 + $0x238] sm:$0xff] }
 0x31d   : > { %v2267_v28 = vpack.c.bf16 %v1499_v27, %v1496_v26 }
 0x31f   : > { %2269 = vmatpush1.bf16.xpose.msk.msra.mxu1 %vm2788_vm2, %v2267_v28 }
 0x321   : > { %2181 = vmatpush1.bf16.xpose.msra.mxu0 %v2180_v42 }
 0x322   : > { %2183 = vmatprep.subr.bf16.mxu0 %v2182_v43 }
 0x329   : > { %2185 = vmatpush1.bf16.xpose.msra.mxu0 %v2184_v50 }
 0x32a   : > { %2187 = vmatprep.subr.bf16.mxu0 %v2186_v51 }
 0x331   : > { %2189 = vmatpush1.bf16.xpose.msra.mxu0 %v2188_v56 }
 0x332   : > { %2191 = vmatprep.subr.bf16.mxu0 %v2190_v57 }
 0x339   : > { %2193 = vmatpush1.bf16.xpose.msra.mxu0 %v2192_v61 }
 0x33a   : > { %2195 = vmatprep.subr.bf16.mxu0 %v2194_v62 }
 0x341   : > { %2197 = vmatpush1.bf16.xpose.msra.mxu0 %v2196_v3 }
 0x342   : > { %2199 = vmatprep.subr.bf16.mxu0 %v2198_v4 }
 0x349   : > { %2201 = vmatpush1.bf16.xpose.msra.mxu0 %v2200_v10 }
 0x34a   : > { %2203 = vmatprep.subr.bf16.mxu0 %v2202_v11 }
 0x351   : > { %2205 = vmatpush1.bf16.xpose.msra.mxu0 %v2204_v14 }
 0x352   : > { %2207 = vmatprep.subr.bf16.mxu0 %v2206_v15 }
 0x359   : > { %2209 = vmatpush1.bf16.xpose.msra.mxu0 %v2208_v19 }
 0x35a   : > { %2211 = vmatprep.subr.bf16.mxu0 %v2210_v20 }
 0x361   : > { %2213 = vmatpush1.bf16.xpose.msra.mxu0 %v2212_v60 }
 0x362   : > { %2215 = vmatprep.subr.bf16.mxu0 %v2214_v29 }
 0x369   : > { %2217 = vmatpush1.bf16.xpose.msra.mxu0 %v2216_v22 }
 0x36a   : > { %2219 = vmatprep.subr.bf16.mxu0 %v2218_v35 }
 0x371   : > { %2221 = vmatpush1.bf16.xpose.msra.mxu0 %v2220_v39 }
 0x3db   : > { %v1331_v41 = vpop.f32.mrb[16].mxu0 }
 0x3dc   : > { %v1333_v42 = vpop.f32.mrb[17].mxu0 }
 0x3dd   : > { %1645 = vmatprep.mubr.f32.mxu0 %v1333_v42 }
 0x3de   : > { %1646 = vmatmul.mubr.f32.vlgmr.msra.gmra.mrb[28].mxu0 %v1331_v41 }
 0x3df   : > { %v1337_v43 = vpop.f32.mrb[18].mxu0 }
 0x3e0   : > { %v1339_v44 = vpop.f32.mrb[19].mxu0 }
 0x3e1   : > { %1651 = vmatprep.mubr.f32.mxu0 %v1339_v44 }
 0x3e2   : > { %1652 = vmatmul.mubr.f32.gmra.mrb[30].mxu0 %v1337_v43 }
 0x3e3   : > { %v1343_v45 = vpop.f32.mrb[20].mxu0 }
 0x3e4   : > { %v1345_v46 = vpop.f32.mrb[21].mxu0 }
 0x3e5   : > { %1657 = vmatprep.mubr.f32.mxu0 %v1345_v46 }
 0x3e6   : > { %1658 = vmatmul.mubr.f32.gmra.mrb[32].mxu0 %v1343_v45 }
 0x3e7   : > { %v1414_v47 = vpop.f32.mrb[22].mxu0 }
 0x3e8   : > { %1947 = vmatmul.mubr.msk.f32.vlgmr.msra.gmra.mrb[20].mxu1 %vm886_vm1, %v1414_v47  ;;  %v1973_v50 = vpop.f32.mrb[23].mxu0 }
 0x3e9   : > { %1734 = vmatprep.mubr.f32.mxu1 %v2394_v7 }
 0x3eb   : > { %v1419_v51 = vpop.f32.mrb[24].mxu0 }
 0x3ec   : > { %1948 = vmatmul.mubr.msk.f32.gmra.mrb[22].mxu1 %vm886_vm1, %v1419_v51  ;;  %v1976_v52 = vpop.f32.mrb[25].mxu0 }
 0x3ed   : > { %1740 = vmatprep.mubr.f32.mxu1 %v2394_v7 }
 0x3ef   : > { %v1424_v53 = vpop.f32.mrb[26].mxu0 }
 0x3f0   : > { %1949 = vmatmul.mubr.msk.f32.gmra.mrb[24].mxu1 %vm886_vm1, %v1424_v53  ;;  %v1979_v54 = vpop.f32.mrb[27].mxu0 }
 0x4b1   : > { %v1647_v55 = vpop.f32.mrb[28].mxu0 }
 0x4b2   : > { %v1649_v56 = vpop.f32.mrb[29].mxu0 }
 0x4b5   : > { %v1653_v57 = vpop.f32.mrb[30].mxu0 }
 0x4b6   : > { %v1655_v58 = vpop.f32.mrb[31].mxu0 }
 0x4b9   : > { %v1659_v59 = vpop.f32.mrb[32].mxu0 }
 0x4ba   : > { %v1661_v37 = vpop.f32.mrb[33].mxu0 }
 0x4bb   : > { %v1730_v40 = vpop.f32.mrb[20].mxu1 }
 0x4bc   : > { %v1731_v61 = vadd.f32 %v1730_v40, %v1647_v55  ;;  %v1732_v62 = vpop.f32.mrb[21].mxu1 }
 0x4bd   : > { %v1733_v63 = vadd.f32 %v1732_v62, %v1649_v56 }
 0x4be   : > { %1747 = vst [vmem:[%s351_s22] sm:$0xff] %v1731_v61 }
 0x4bf   : > { %1748 = vst.msk [vmem:[%s351_s22 + $0x8] sm:$0xff] %vm886_vm1, %v1733_v63  ;;  %v1736_v7 = vpop.f32.mrb[22].mxu1 }
 0x4c0   : > { %v1737_v0 = vadd.f32 %v1736_v7, %v1653_v57  ;;  %v1738_v1 = vpop.f32.mrb[23].mxu1 }
 0x4c1   : > { %v1739_v2 = vadd.f32 %v1738_v1, %v1655_v58 }
 0x4c2   : > { %1749 = vst [vmem:[%s351_s22 + $0x10] sm:$0xff] %v1737_v0 }
 0x4c3   : > { %1750 = vst.msk [vmem:[%s351_s22 + $0x18] sm:$0xff] %vm886_vm1, %v1739_v2  ;;  %v1742_v3 = vpop.f32.mrb[24].mxu1 }
 0x4c4   : > { %v1743_v4 = vadd.f32 %v1742_v3, %v1659_v59  ;;  %v1744_v5 = vpop.f32.mrb[25].mxu1 }
 0x4c5   : > { %v1745_v6 = vadd.f32 %v1744_v5, %v1661_v37 }
 0x4c6   : > { %1751 = vst [vmem:[%s351_s22 + $0x20] sm:$0xff] %v1743_v4 }
 0x4c7   : > { %1752 = vst.msk [vmem:[%s351_s22 + $0x28] sm:$0xff] %vm886_vm1, %v1745_v6 }
 0x4c8   : > { %2343 = shalt.err (!%p2340_p3)
}
 0x4c9   : > { %s2344_s16 = scalar_lea.hbm %s3404_s18, 768  ;;  %s2348_s29 = scalar_lea.hbm %s3457_s9, 1536 }
 0x4ca   : > { %p2345_p4 = scmp.ne.s32.totalorder %s3404_s18, %s2344_s16  ;;  %p2349_p9 = scmp.lt.u32.totalorder %s3404_s18, %s3457_s9 }
 0x4cb   : > { %p2350_p10 = scmp.lt.u32.totalorder %s2348_s29, %s2344_s16  ;;  %p2352_p12 = scmp.lt.u32.totalorder %s2344_s16, %s3404_s18 }
 0x4cc   : > { %p2346_p7 = pnand %p2345_p4, %p2488_p5 }
 0x4cd   : > { %p2351_p11 = por %p2350_p10, %p2349_p9 }
 0x4ce   : > { %p2347_p8 = pneg %p2346_p7 }
 0x4cf   : > { %p2353_p13 = por %p2352_p12, %p2351_p11 }
 0x4d1   : > { %p2354_p0 = pnand %p2353_p13, %p2347_p8 }
 0x4d3   : > { %2357 = shalt.err (!%p2354_p0)
}
 0x4d4   : > { %s2398_s21 = smov 256   ;;  %s2399_s24 = smov 16  }
 0x4d5   : > { %2286 = dma.vmem_to_hbm [thread:$0]  (%p2488_p5), %s3399_s23, 768, %s3404_s18, %s3407_s13, %s2398_s21, %s2398_s21, %s2399_s24  }
 0x4d6 PF: > { %p2292_p1 = scmp.ge.s32.totalorder %s2392_s12, 2  ;;  %s1782_s25 = sand.u32 1, %s2380_s30  }
 0x4d7   : > { %s1783_s11 = scalar_lea.sflag [#allocation3], %s1782_s25 }
 0x4d8   : > { %p2289_p2 = pnand %p2292_p1, %p2492_p6 }
 0x4da   : > { %2375 = dma.done.wait (!%p2289_p2), %s1783_s11, 768  }
 0x4db   : > { %2377 = vsyncadd (!%p2289_p2), %s1783_s11, 4294966528  ;;  %s3468_s12 = sld [smem:[#allocation6_spill]]  ;;  %s3469_s14 = sld [smem:[#allocation5_spill]] }
 0x4dc   : > { %s3470_s11 = sld [smem:[#allocation7_spill]]  ;;  %s3471_s30 = smov %s2384_s10 }
 0x4e1   : > { %p19_p3 = scmp.ge.s32.totalorder %s3468_s12, 4   ;;  %s3472_s10 = smov %s3469_s14 }
 0x4e3   :  { %21 = sbr.rel (!%p19_p3) target bundleno = 3 (0x3), region = 97 }
 0x4ea   :  { %1788 = vsyncpa [#allocation3], 1 }
 0x4eb   :  { %1790 = vsyncpa [#allocation3 + $0x1], 1 }

</bundles_post_ra>
